<compile_context>
chip_gen: v7x
topology: tpu7x:2x2x1
jax: 0.10.0
libtpu: 0.0.40
codegen_flags: <defaults>
</compile_context>

<pallas_src>
import functools

import numpy as np
import jax
import jax.numpy as jnp
from jax import lax
from jax.experimental import pallas as pl
from jax.experimental.pallas import tpu as pltpu


# --------------------------- fused bidirectional LSTM layer ---------------------------
def _bilstm_layer_kernel(x_ref, wih_ref, b_ref, whh_ref, out_ref,
                         xproj_ref, h_ref, c_ref, *, L, B, H):
    """One full bidirectional LSTM layer in a single kernel invocation.

    x_ref    : (L*B, I)   time-major flattened layer input
    wih_ref  : (I, 8H)    [W_ih_fwd^T | W_ih_bwd^T], gate order (i,f,g,o) per direction
    b_ref    : (1, 8H)    [b_fwd | b_bwd]  (b_ih + b_hh per direction)
    whh_ref  : (2H, 8H)   block-diagonal [W_hh_fwd^T | W_hh_bwd^T]
    out_ref  : (L, B, 2H) hidden states, lanes [0:H]=forward, [H:2H]=backward
    """
    H4 = 4 * H

    # (1) hoisted input projection: one big MXU matmul for all timesteps / both dirs.
    xproj_ref[...] = (
        jnp.dot(x_ref[...], wih_ref[...], preferred_element_type=jnp.float32)
        + b_ref[...])

    # (2) recurrence with resident weights and carries.
    h_ref[...] = jnp.zeros_like(h_ref)
    c_ref[...] = jnp.zeros_like(c_ref)

    def cell(g4, c_prev):
        i = jax.nn.sigmoid(g4[:, 0 * H:1 * H])
        f = jax.nn.sigmoid(g4[:, 1 * H:2 * H])
        g = jnp.tanh(g4[:, 2 * H:3 * H])
        o = jax.nn.sigmoid(g4[:, 3 * H:4 * H])
        c_new = f * c_prev + i * g
        h_new = o * jnp.tanh(c_new)
        return h_new, c_new

    for t in range(L):                       # static unroll (L is small here)
        rt = L - 1 - t                       # backward direction consumes time rt
        # single recurrent matmul drives both directions (block-diagonal RHS)
        hh = jnp.dot(h_ref[...], whh_ref[...], preferred_element_type=jnp.float32)
        xg_f = xproj_ref[t * B:(t + 1) * B, :H4]       # (B, 4H)
        xg_b = xproj_ref[rt * B:(rt + 1) * B, H4:]     # (B, 4H)
        gates = jnp.concatenate([xg_f, xg_b], axis=-1) + hh   # (B, 8H)

        c_all = c_ref[...]
        h_f, c_f = cell(gates[:, :H4], c_all[:, :H])
        h_b, c_b = cell(gates[:, H4:], c_all[:, H:])

        h_ref[...] = jnp.concatenate([h_f, h_b], axis=-1)
        c_ref[...] = jnp.concatenate([c_f, c_b], axis=-1)

        # stores go to the VMEM-resident output slab; HBM writeback happens once.
        out_ref[t, :, :H] = h_f
        out_ref[rt, :, H:] = h_b


def bilstm_layer(x_flat, wih_cat, bias_cat, whh_bd, *, L, B, H):
    kernel = functools.partial(_bilstm_layer_kernel, L=L, B=B, H=H)
    return pl.pallas_call(
        kernel,
        out_shape=jax.ShapeDtypeStruct((L, B, 2 * H), jnp.float32),
        scratch_shapes=[
            pltpu.VMEM((L * B, 8 * H), jnp.float32),   # precomputed input projection
            pltpu.VMEM((B, 2 * H), jnp.float32),       # h carry  [fwd | bwd]
            pltpu.VMEM((B, 2 * H), jnp.float32),       # c carry  [fwd | bwd]
        ],
    )(x_flat, wih_cat, bias_cat, whh_bd)


# ------------------------- fused kmax pooling + FC head -------------------------
def _tail_kernel(y_ref, w1_ref, b1_ref, gamma_ref, beta_ref, mean_ref, var_ref,
                 w2_ref, b2_ref, out_ref, *, L, k):
    """kmax pooling over time (values kept in time order) + Linear/BN/ReLU/Linear.

    y_ref : (L, B, 2H) final LSTM layer output.
    Equivalent to x.topk(k)[1].sort() gather, assuming no exact float ties
    (true for real-valued LSTM outputs).
    """
    Y = y_ref[...]                                   # (L, B, 2H)

    # k-th largest value per (batch, feature): k iterated maxes over the time axis.
    work = Y
    thresh = None
    for _ in range(k):
        cur = work[0]
        for t in range(1, L):
            cur = jnp.maximum(cur, work[t])          # (B, 2H)
        thresh = cur
        work = jnp.where(work >= thresh[None], -1e30, work)

    sel = (Y >= thresh[None]).astype(jnp.float32)    # (L, B, 2H): k largest selected

    # j-th selected element in time order, via a running selection count.
    acc = [jnp.zeros_like(Y[0]) for _ in range(k)]   # each (B, 2H)
    csum = jnp.zeros_like(Y[0])
    for t in range(L):
        csum = csum + sel[t]
        for j in range(k):
            pick = sel[t] * (csum == float(j + 1)).astype(jnp.float32)
            acc[j] = acc[j] + Y[t] * pick

    # (B, k*2H) lane-dense FC input; w1 rows are pre-permuted to match this layout.
    pooled = jnp.concatenate(acc, axis=-1)

    h = jnp.dot(pooled, w1_ref[...], preferred_element_type=jnp.float32) + b1_ref[...]
    # BatchNorm1d (eval mode, running stats)
    h = (h - mean_ref[...]) * gamma_ref[...] * lax.rsqrt(var_ref[...] + 1e-5) + beta_ref[...]
    h = jnp.maximum(h, 0.0)
    out_ref[...] = jnp.dot(h, w2_ref[...], preferred_element_type=jnp.float32) + b2_ref[...]


def tail_forward(y, fc, *, L, k):
    B = y.shape[1]
    C = fc["w2"].shape[1]
    kernel = functools.partial(_tail_kernel, L=L, k=k)
    return pl.pallas_call(
        kernel,
        out_shape=jax.ShapeDtypeStruct((B, C), jnp.float32),
    )(y, fc["w1_perm"], fc["b1"], fc["gamma"], fc["beta"], fc["mean"], fc["var"],
      fc["w2"], fc["b2"])


# ------------------------------ full forward ------------------------------
def lstm_text_forward(ids, params, cfg):
    B, L = ids.shape
    H, k = cfg["hidden_dim"], cfg["kmax"]
    # Embedding lookup (gather) stays in plain JAX glue.
    emb = jnp.take(params["embedding"], ids, axis=0)             # (B, L, E)
    # LockDrop dropout (p=0.4) is identity in eval mode.
    x = jnp.transpose(emb, (1, 0, 2)).astype(jnp.float32)        # (L, B, E) time-major
    x = x.reshape(L * B, -1)                                     # (L*B, E)
    y = None
    for l in range(cfg["num_layers"]):
        wih_cat, bias_cat, whh_bd = params["lstm_fused"][l]
        y = bilstm_layer(x, wih_cat, bias_cat, whh_bd, L=L, B=B, H=H)   # (L, B, 2H)
        x = y.reshape(L * B, 2 * H)                              # free reshape, no concat
    return tail_forward(y, params["fc"], L=L, k=k)


# ------------------------------ params ------------------------------
def init_params(key, cfg):
    V, E, H = cfg["vocab_size"], cfg["embed_dim"], cfg["hidden_dim"]
    NL, LH, K, C = cfg["num_layers"], cfg["linear_hidden_dim"], cfg["kmax"], cfg["num_classes"]
    keys = iter(jax.random.split(key, 128))

    def rnd(shape, scale=0.1):
        return scale * jax.random.normal(next(keys), shape, jnp.float32)

    emb = rnd((V, E)).at[0].set(0.0)                             # padding_idx=0 row is zero

    lstm_raw = {}
    lstm_fused = []
    for l in range(NL):
        I = E if l == 0 else 2 * H
        per_dir = []
        for d in range(2):                                       # 0: forward, 1: backward
            wih = rnd((4 * H, I))
            whh = rnd((4 * H, H))
            bih = rnd((4 * H,))
            bhh = rnd((4 * H,))
            lstm_raw[(l, d)] = (wih.T, whh.T, (bih + bhh).reshape(1, 4 * H))
            per_dir.append(lstm_raw[(l, d)])
        (wih_f, whh_f, b_f), (wih_b, whh_b, b_b) = per_dir
        wih_cat = jnp.concatenate([wih_f, wih_b], axis=1)        # (I, 8H)
        bias_cat = jnp.concatenate([b_f, b_b], axis=1)           # (1, 8H)
        whh_bd = jnp.zeros((2 * H, 8 * H), jnp.float32)          # block-diagonal recurrent W
        whh_bd = whh_bd.at[:H, :4 * H].set(whh_f)
        whh_bd = whh_bd.at[H:, 4 * H:].set(whh_b)
        lstm_fused.append((wih_cat, bias_cat, whh_bd))

    w1 = rnd((LH, K * 2 * H))
    b1 = rnd((LH,))
    w2 = rnd((C, LH))
    b2 = rnd((C,))
    w1_t = w1.T                                                  # (2H*K, LH), rows = f*K + j
    # permute W1 rows so the kernel's [j-major, feature] pooled layout matches
    # PyTorch's out.view(B, -1) (feature-major, then k) ordering.
    perm = np.arange(2 * H * K).reshape(2 * H, K).T.reshape(-1)  # new row j*2H+f -> old f*K+j
    fc = dict(
        w1=w1_t, w1_perm=w1_t[perm], b1=b1.reshape(1, -1),
        gamma=jnp.ones((1, LH), jnp.float32), beta=jnp.zeros((1, LH), jnp.float32),
        mean=jnp.zeros((1, LH), jnp.float32), var=jnp.ones((1, LH), jnp.float32),
        w2=w2.T, b2=b2.reshape(1, -1),
    )
    return {"embedding": emb, "lstm": lstm_raw, "lstm_fused": lstm_fused, "fc": fc}


# ------------------------------ pure-JAX reference ------------------------------
def reference_forward(ids, params, cfg):
    H, K = cfg["hidden_dim"], cfg["kmax"]
    inp = jnp.take(params["embedding"], ids, axis=0)
    for l in range(cfg["num_layers"]):
        outs = []
        for d in range(2):
            wih_t, whh_t, b = params["lstm"][(l, d)]
            B, L, _ = inp.shape
            h = jnp.zeros((B, H), jnp.float32)
            c = jnp.zeros((B, H), jnp.float32)
            hs = [None] * L
            times = range(L - 1, -1, -1) if d == 1 else range(L)
            for t in times:
                gates = inp[:, t] @ wih_t + h @ whh_t + b
                ii = jax.nn.sigmoid(gates[:, :H])
                ff = jax.nn.sigmoid(gates[:, H:2 * H])
                gg = jnp.tanh(gates[:, 2 * H:3 * H])
                oo = jax.nn.sigmoid(gates[:, 3 * H:])
                c = ff * c + ii * gg
                h = oo * jnp.tanh(c)
                hs[t] = h
            outs.append(jnp.stack(hs, axis=1))
        inp = jnp.concatenate(outs, axis=-1)
    out = jnp.transpose(inp, (0, 2, 1))                          # (B, 2H, L)
    _, idx = lax.top_k(out, K)
    idx = jnp.sort(idx, axis=-1)
    pooled = jnp.take_along_axis(out, idx, axis=-1)
    reshaped = pooled.reshape(out.shape[0], -1)
    fc = params["fc"]
    h1 = reshaped @ fc["w1"] + fc["b1"]
    h1 = (h1 - fc["mean"]) * fc["gamma"] / jnp.sqrt(fc["var"] + 1e-5) + fc["beta"]
    h1 = jnp.maximum(h1, 0.0)
    return h1 @ fc["w2"] + fc["b2"]


if __name__ == "__main__":
    cfg = dict(vocab_size=50, embed_dim=32, hidden_dim=32, num_layers=2,
               linear_hidden_dim=64, kmax=2, num_classes=10, batch=2, seq_len=8)
    key = jax.random.PRNGKey(0)
    pkey, dkey = jax.random.split(key)
    params = init_params(pkey, cfg)
    ids = jax.random.randint(dkey, (cfg["batch"], cfg["seq_len"]), 0,
                             cfg["vocab_size"], dtype=jnp.int32)

    logits = jax.block_until_ready(lstm_text_forward(ids, params, cfg))
    with jax.default_matmul_precision("highest"):
        ref = jax.block_until_ready(reference_forward(ids, params, cfg))

    assert logits.shape == (cfg["batch"], cfg["num_classes"])
    np.testing.assert_allclose(np.asarray(logits), np.asarray(ref), atol=2e-2, rtol=2e-2)
    print("KERNEL_OK")
</pallas_src>

<mosaic_0001>
module attributes {stable_mosaic.version = 11 : i64} {
  func.func @_bilstm_layer_kernel(%arg0: memref<16x32xf32, #tpu.memory_space<vmem>>, %arg1: memref<32x256xf32, #tpu.memory_space<vmem>>, %arg2: memref<1x256xf32, #tpu.memory_space<vmem>>, %arg3: memref<64x256xf32, #tpu.memory_space<vmem>>, %arg4: memref<8x2x64xf32, #tpu.memory_space<vmem>>, %arg5: memref<16x256xf32, #tpu.memory_space<vmem>>, %arg6: memref<2x64xf32, #tpu.memory_space<vmem>>, %arg7: memref<2x64xf32, #tpu.memory_space<vmem>>) attributes {dimension_semantics = [], scalar_prefetch = 0 : i64, scratch_operands = 3 : i64, tpu.core_type = #tpu.core_type<tc>} {
    %c0 = arith.constant 0 : index
    %c0_0 = arith.constant 0 : index
    %0 = vector.load %arg0[%c0, %c0_0] : memref<16x32xf32, #tpu.memory_space<vmem>>, vector<16x32xf32>
    %c0_1 = arith.constant 0 : index
    %c0_2 = arith.constant 0 : index
    %1 = vector.load %arg1[%c0_1, %c0_2] : memref<32x256xf32, #tpu.memory_space<vmem>>, vector<32x256xf32>
    %cst = arith.constant dense<0.000000e+00> : vector<16x256xf32>
    %2 = tpu.matmul %0, %1, %cst {dimension_numbers = #tpu.dot_dimension_numbers<[1], [0], [0], [1], [0, 0, 1, 1], [], []>} : vector<16x32xf32>, vector<32x256xf32>, vector<16x256xf32> -> vector<16x256xf32>
    %c0_3 = arith.constant 0 : index
    %c0_4 = arith.constant 0 : index
    %3 = vector.load %arg2[%c0_3, %c0_4] : memref<1x256xf32, #tpu.memory_space<vmem>>, vector<1x256xf32>
    %4 = vector.broadcast %3 : vector<1x256xf32> to vector<16x256xf32>
    %5 = arith.addf %2, %4 : vector<16x256xf32>
    %c0_5 = arith.constant 0 : index
    %c0_6 = arith.constant 0 : index
    %6 = vector.load %arg5[%c0_5, %c0_6] : memref<16x256xf32, #tpu.memory_space<vmem>>, vector<16x256xf32>
    tpu.vector_store %arg5[%c0_5, %c0_6], %5 {strides = array<i32>} : memref<16x256xf32, #tpu.memory_space<vmem>>, vector<16x256xf32>,
    %cst_7 = arith.constant 0.000000e+00 : f32
    %7 = vector.broadcast %cst_7 : f32 to vector<2x64xf32>
    %c0_8 = arith.constant 0 : index
    %c0_9 = arith.constant 0 : index
    %8 = vector.load %arg6[%c0_8, %c0_9] : memref<2x64xf32, #tpu.memory_space<vmem>>, vector<2x64xf32>
    tpu.vector_store %arg6[%c0_8, %c0_9], %7 {strides = array<i32>} : memref<2x64xf32, #tpu.memory_space<vmem>>, vector<2x64xf32>,
    %cst_10 = arith.constant 0.000000e+00 : f32
    %9 = vector.broadcast %cst_10 : f32 to vector<2x64xf32>
    %c0_11 = arith.constant 0 : index
    %c0_12 = arith.constant 0 : index
    %10 = vector.load %arg7[%c0_11, %c0_12] : memref<2x64xf32, #tpu.memory_space<vmem>>, vector<2x64xf32>
    tpu.vector_store %arg7[%c0_11, %c0_12], %9 {strides = array<i32>} : memref<2x64xf32, #tpu.memory_space<vmem>>, vector<2x64xf32>,
    %c0_13 = arith.constant 0 : index
    %c0_14 = arith.constant 0 : index
    %11 = vector.load %arg6[%c0_13, %c0_14] : memref<2x64xf32, #tpu.memory_space<vmem>>, vector<2x64xf32>
    %c0_15 = arith.constant 0 : index
    %c0_16 = arith.constant 0 : index
    %12 = vector.load %arg3[%c0_15, %c0_16] : memref<64x256xf32, #tpu.memory_space<vmem>>, vector<64x256xf32>
    %cst_17 = arith.constant dense<0.000000e+00> : vector<2x256xf32>
    %13 = tpu.matmul %11, %12, %cst_17 {dimension_numbers = #tpu.dot_dimension_numbers<[1], [0], [0], [1], [0, 0, 1, 1], [], []>} : vector<2x64xf32>, vector<64x256xf32>, vector<2x256xf32> -> vector<2x256xf32>
    %c0_18 = arith.constant 0 : index
    %c0_19 = arith.constant 0 : index
    %14 = vector.load %arg5[%c0_18, %c0_19] : memref<16x256xf32, #tpu.memory_space<vmem>>, vector<2x128xf32>
    %c14 = arith.constant 14 : index
    %c128 = arith.constant 128 : index
    %15 = vector.load %arg5[%c14, %c128] : memref<16x256xf32, #tpu.memory_space<vmem>>, vector<2x128xf32>
    %16 = tpu.concatenate %14, %15 in 1 : vector<2x128xf32>, vector<2x128xf32> -> vector<2x256xf32>
    %17 = arith.addf %16, %13 : vector<2x256xf32>
    %c0_20 = arith.constant 0 : index
    %c0_21 = arith.constant 0 : index
    %18 = vector.load %arg7[%c0_20, %c0_21] : memref<2x64xf32, #tpu.memory_space<vmem>>, vector<2x64xf32>
    %19 = vector.extract_strided_slice %17 {offsets = [0, 0], sizes = [2, 128], strides = [1, 1]} : vector<2x256xf32> to vector<2x128xf32>
    %20 = vector.extract_strided_slice %18 {offsets = [0, 0], sizes = [2, 32], strides = [1, 1]} : vector<2x64xf32> to vector<2x32xf32>
    %21 = vector.extract_strided_slice %19 {offsets = [0, 0], sizes = [2, 32], strides = [1, 1]} : vector<2x128xf32> to vector<2x32xf32>
    %22 = arith.negf %21 : vector<2x32xf32>
    %23 = math.exp %22 : vector<2x32xf32>
    %cst_22 = arith.constant 1.000000e+00 : f32
    %24 = vector.broadcast %cst_22 : f32 to vector<2x32xf32>
    %25 = arith.addf %24, %23 : vector<2x32xf32>
    %26 = arith.divf %24, %25 : vector<2x32xf32>
    %27 = vector.extract_strided_slice %19 {offsets = [0, 32], sizes = [2, 32], strides = [1, 1]} : vector<2x128xf32> to vector<2x32xf32>
    %28 = arith.negf %27 : vector<2x32xf32>
    %29 = math.exp %28 : vector<2x32xf32>
    %cst_23 = arith.constant 1.000000e+00 : f32
    %30 = vector.broadcast %cst_23 : f32 to vector<2x32xf32>
    %31 = arith.addf %30, %29 : vector<2x32xf32>
    %32 = arith.divf %30, %31 : vector<2x32xf32>
    %33 = vector.extract_strided_slice %19 {offsets = [0, 64], sizes = [2, 32], strides = [1, 1]} : vector<2x128xf32> to vector<2x32xf32>
    %34 = math.tanh %33 : vector<2x32xf32>
    %35 = vector.extract_strided_slice %19 {offsets = [0, 96], sizes = [2, 32], strides = [1, 1]} : vector<2x128xf32> to vector<2x32xf32>
    %36 = arith.negf %35 : vector<2x32xf32>
    %37 = math.exp %36 : vector<2x32xf32>
    %cst_24 = arith.constant 1.000000e+00 : f32
    %38 = vector.broadcast %cst_24 : f32 to vector<2x32xf32>
    %39 = arith.addf %38, %37 : vector<2x32xf32>
    %40 = arith.divf %38, %39 : vector<2x32xf32>
    %41 = arith.mulf %32, %20 : vector<2x32xf32>
    %42 = arith.mulf %26, %34 : vector<2x32xf32>
    %43 = arith.addf %41, %42 : vector<2x32xf32>
    %44 = math.tanh %43 : vector<2x32xf32>
    %45 = arith.mulf %40, %44 : vector<2x32xf32>
    %46 = vector.extract_strided_slice %17 {offsets = [0, 128], sizes = [2, 128], strides = [1, 1]} : vector<2x256xf32> to vector<2x128xf32>
    %47 = vector.extract_strided_slice %18 {offsets = [0, 32], sizes = [2, 32], strides = [1, 1]} : vector<2x64xf32> to vector<2x32xf32>
    %48 = vector.extract_strided_slice %46 {offsets = [0, 0], sizes = [2, 32], strides = [1, 1]} : vector<2x128xf32> to vector<2x32xf32>
    %49 = arith.negf %48 : vector<2x32xf32>
    %50 = math.exp %49 : vector<2x32xf32>
    %cst_25 = arith.constant 1.000000e+00 : f32
    %51 = vector.broadcast %cst_25 : f32 to vector<2x32xf32>
    %52 = arith.addf %51, %50 : vector<2x32xf32>
    %53 = arith.divf %51, %52 : vector<2x32xf32>
    %54 = vector.extract_strided_slice %46 {offsets = [0, 32], sizes = [2, 32], strides = [1, 1]} : vector<2x128xf32> to vector<2x32xf32>
    %55 = arith.negf %54 : vector<2x32xf32>
    %56 = math.exp %55 : vector<2x32xf32>
    %cst_26 = arith.constant 1.000000e+00 : f32
    %57 = vector.broadcast %cst_26 : f32 to vector<2x32xf32>
    %58 = arith.addf %57, %56 : vector<2x32xf32>
    %59 = arith.divf %57, %58 : vector<2x32xf32>
    %60 = vector.extract_strided_slice %46 {offsets = [0, 64], sizes = [2, 32], strides = [1, 1]} : vector<2x128xf32> to vector<2x32xf32>
    %61 = math.tanh %60 : vector<2x32xf32>
    %62 = vector.extract_strided_slice %46 {offsets = [0, 96], sizes = [2, 32], strides = [1, 1]} : vector<2x128xf32> to vector<2x32xf32>
    %63 = arith.negf %62 : vector<2x32xf32>
    %64 = math.exp %63 : vector<2x32xf32>
    %cst_27 = arith.constant 1.000000e+00 : f32
    %65 = vector.broadcast %cst_27 : f32 to vector<2x32xf32>
    %66 = arith.addf %65, %64 : vector<2x32xf32>
    %67 = arith.divf %65, %66 : vector<2x32xf32>
    %68 = arith.mulf %59, %47 : vector<2x32xf32>
    %69 = arith.mulf %53, %61 : vector<2x32xf32>
    %70 = arith.addf %68, %69 : vector<2x32xf32>
    %71 = math.tanh %70 : vector<2x32xf32>
    %72 = arith.mulf %67, %71 : vector<2x32xf32>
    %73 = tpu.concatenate %45, %72 in 1 : vector<2x32xf32>, vector<2x32xf32> -> vector<2x64xf32>
    %c0_28 = arith.constant 0 : index
    %c0_29 = arith.constant 0 : index
    %74 = vector.load %arg6[%c0_28, %c0_29] : memref<2x64xf32, #tpu.memory_space<vmem>>, vector<2x64xf32>
    tpu.vector_store %arg6[%c0_28, %c0_29], %73 {strides = array<i32>} : memref<2x64xf32, #tpu.memory_space<vmem>>, vector<2x64xf32>,
    %75 = tpu.concatenate %43, %70 in 1 : vector<2x32xf32>, vector<2x32xf32> -> vector<2x64xf32>
    %c0_30 = arith.constant 0 : index
    %c0_31 = arith.constant 0 : index
    %76 = vector.load %arg7[%c0_30, %c0_31] : memref<2x64xf32, #tpu.memory_space<vmem>>, vector<2x64xf32>
    tpu.vector_store %arg7[%c0_30, %c0_31], %75 {strides = array<i32>} : memref<2x64xf32, #tpu.memory_space<vmem>>, vector<2x64xf32>,
    %c0_32 = arith.constant 0 : index
    %c0_33 = arith.constant 0 : index
    %c0_34 = arith.constant 0 : index
    %77 = vector.load %arg4[%c0_32, %c0_33, %c0_34] : memref<8x2x64xf32, #tpu.memory_space<vmem>>, vector<1x2x32xf32>
    %78 = vector.shape_cast %77 : vector<1x2x32xf32> to vector<2x32xf32>
    %79 = vector.shape_cast %45 : vector<2x32xf32> to vector<1x2x32xf32>
    tpu.vector_store %arg4[%c0_32, %c0_33, %c0_34], %79 {strides = array<i32>} : memref<8x2x64xf32, #tpu.memory_space<vmem>>, vector<1x2x32xf32>,
    %c7 = arith.constant 7 : index
    %c0_35 = arith.constant 0 : index
    %c32 = arith.constant 32 : index
    %80 = vector.load %arg4[%c7, %c0_35, %c32] : memref<8x2x64xf32, #tpu.memory_space<vmem>>, vector<1x2x32xf32>
    %81 = vector.shape_cast %80 : vector<1x2x32xf32> to vector<2x32xf32>
    %82 = vector.shape_cast %72 : vector<2x32xf32> to vector<1x2x32xf32>
    tpu.vector_store %arg4[%c7, %c0_35, %c32], %82 {strides = array<i32>} : memref<8x2x64xf32, #tpu.memory_space<vmem>>, vector<1x2x32xf32>,
    %c0_36 = arith.constant 0 : index
    %c0_37 = arith.constant 0 : index
    %83 = vector.load %arg6[%c0_36, %c0_37] : memref<2x64xf32, #tpu.memory_space<vmem>>, vector<2x64xf32>
    %c0_38 = arith.constant 0 : index
    %c0_39 = arith.constant 0 : index
    %84 = vector.load %arg3[%c0_38, %c0_39] : memref<64x256xf32, #tpu.memory_space<vmem>>, vector<64x256xf32>
    %cst_40 = arith.constant dense<0.000000e+00> : vector<2x256xf32>
    %85 = tpu.matmul %83, %84, %cst_40 {dimension_numbers = #tpu.dot_dimension_numbers<[1], [0], [0], [1], [0, 0, 1, 1], [], []>} : vector<2x64xf32>, vector<64x256xf32>, vector<2x256xf32> -> vector<2x256xf32>
    %c2 = arith.constant 2 : index
    %c0_41 = arith.constant 0 : index
    %86 = vector.load %arg5[%c2, %c0_41] : memref<16x256xf32, #tpu.memory_space<vmem>>, vector<2x128xf32>
    %c12 = arith.constant 12 : index
    %c128_42 = arith.constant 128 : index
    %87 = vector.load %arg5[%c12, %c128_42] : memref<16x256xf32, #tpu.memory_space<vmem>>, vector<2x128xf32>
    %88 = tpu.concatenate %86, %87 in 1 : vector<2x128xf32>, vector<2x128xf32> -> vector<2x256xf32>
    %89 = arith.addf %88, %85 : vector<2x256xf32>
    %c0_43 = arith.constant 0 : index
    %c0_44 = arith.constant 0 : index
    %90 = vector.load %arg7[%c0_43, %c0_44] : memref<2x64xf32, #tpu.memory_space<vmem>>, vector<2x64xf32>
    %91 = vector.extract_strided_slice %89 {offsets = [0, 0], sizes = [2, 128], strides = [1, 1]} : vector<2x256xf32> to vector<2x128xf32>
    %92 = vector.extract_strided_slice %90 {offsets = [0, 0], sizes = [2, 32], strides = [1, 1]} : vector<2x64xf32> to vector<2x32xf32>
    %93 = vector.extract_strided_slice %91 {offsets = [0, 0], sizes = [2, 32], strides = [1, 1]} : vector<2x128xf32> to vector<2x32xf32>
    %94 = arith.negf %93 : vector<2x32xf32>
    %95 = math.exp %94 : vector<2x32xf32>
    %cst_45 = arith.constant 1.000000e+00 : f32
    %96 = vector.broadcast %cst_45 : f32 to vector<2x32xf32>
    %97 = arith.addf %96, %95 : vector<2x32xf32>
    %98 = arith.divf %96, %97 : vector<2x32xf32>
    %99 = vector.extract_strided_slice %91 {offsets = [0, 32], sizes = [2, 32], strides = [1, 1]} : vector<2x128xf32> to vector<2x32xf32>
    %100 = arith.negf %99 : vector<2x32xf32>
    %101 = math.exp %100 : vector<2x32xf32>
    %cst_46 = arith.constant 1.000000e+00 : f32
    %102 = vector.broadcast %cst_46 : f32 to vector<2x32xf32>
    %103 = arith.addf %102, %101 : vector<2x32xf32>
    %104 = arith.divf %102, %103 : vector<2x32xf32>
    %105 = vector.extract_strided_slice %91 {offsets = [0, 64], sizes = [2, 32], strides = [1, 1]} : vector<2x128xf32> to vector<2x32xf32>
    %106 = math.tanh %105 : vector<2x32xf32>
    %107 = vector.extract_strided_slice %91 {offsets = [0, 96], sizes = [2, 32], strides = [1, 1]} : vector<2x128xf32> to vector<2x32xf32>
    %108 = arith.negf %107 : vector<2x32xf32>
    %109 = math.exp %108 : vector<2x32xf32>
    %cst_47 = arith.constant 1.000000e+00 : f32
    %110 = vector.broadcast %cst_47 : f32 to vector<2x32xf32>
    %111 = arith.addf %110, %109 : vector<2x32xf32>
    %112 = arith.divf %110, %111 : vector<2x32xf32>
    %113 = arith.mulf %104, %92 : vector<2x32xf32>
    %114 = arith.mulf %98, %106 : vector<2x32xf32>
    %115 = arith.addf %113, %114 : vector<2x32xf32>
    %116 = math.tanh %115 : vector<2x32xf32>
    %117 = arith.mulf %112, %116 : vector<2x32xf32>
    %118 = vector.extract_strided_slice %89 {offsets = [0, 128], sizes = [2, 128], strides = [1, 1]} : vector<2x256xf32> to vector<2x128xf32>
    %119 = vector.extract_strided_slice %90 {offsets = [0, 32], sizes = [2, 32], strides = [1, 1]} : vector<2x64xf32> to vector<2x32xf32>
    %120 = vector.extract_strided_slice %118 {offsets = [0, 0], sizes = [2, 32], strides = [1, 1]} : vector<2x128xf32> to vector<2x32xf32>
    %121 = arith.negf %120 : vector<2x32xf32>
    %122 = math.exp %121 : vector<2x32xf32>
    %cst_48 = arith.constant 1.000000e+00 : f32
    %123 = vector.broadcast %cst_48 : f32 to vector<2x32xf32>
    %124 = arith.addf %123, %122 : vector<2x32xf32>
    %125 = arith.divf %123, %124 : vector<2x32xf32>
    %126 = vector.extract_strided_slice %118 {offsets = [0, 32], sizes = [2, 32], strides = [1, 1]} : vector<2x128xf32> to vector<2x32xf32>
    %127 = arith.negf %126 : vector<2x32xf32>
    %128 = math.exp %127 : vector<2x32xf32>
    %cst_49 = arith.constant 1.000000e+00 : f32
    %129 = vector.broadcast %cst_49 : f32 to vector<2x32xf32>
    %130 = arith.addf %129, %128 : vector<2x32xf32>
    %131 = arith.divf %129, %130 : vector<2x32xf32>
    %132 = vector.extract_strided_slice %118 {offsets = [0, 64], sizes = [2, 32], strides = [1, 1]} : vector<2x128xf32> to vector<2x32xf32>
    %133 = math.tanh %132 : vector<2x32xf32>
    %134 = vector.extract_strided_slice %118 {offsets = [0, 96], sizes = [2, 32], strides = [1, 1]} : vector<2x128xf32> to vector<2x32xf32>
    %135 = arith.negf %134 : vector<2x32xf32>
    %136 = math.exp %135 : vector<2x32xf32>
    %cst_50 = arith.constant 1.000000e+00 : f32
    %137 = vector.broadcast %cst_50 : f32 to vector<2x32xf32>
    %138 = arith.addf %137, %136 : vector<2x32xf32>
    %139 = arith.divf %137, %138 : vector<2x32xf32>
    %140 = arith.mulf %131, %119 : vector<2x32xf32>
    %141 = arith.mulf %125, %133 : vector<2x32xf32>
    %142 = arith.addf %140, %141 : vector<2x32xf32>
    %143 = math.tanh %142 : vector<2x32xf32>
    %144 = arith.mulf %139, %143 : vector<2x32xf32>
    %145 = tpu.concatenate %117, %144 in 1 : vector<2x32xf32>, vector<2x32xf32> -> vector<2x64xf32>
    %c0_51 = arith.constant 0 : index
    %c0_52 = arith.constant 0 : index
    %146 = vector.load %arg6[%c0_51, %c0_52] : memref<2x64xf32, #tpu.memory_space<vmem>>, vector<2x64xf32>
    tpu.vector_store %arg6[%c0_51, %c0_52], %145 {strides = array<i32>} : memref<2x64xf32, #tpu.memory_space<vmem>>, vector<2x64xf32>,
    %147 = tpu.concatenate %115, %142 in 1 : vector<2x32xf32>, vector<2x32xf32> -> vector<2x64xf32>
    %c0_53 = arith.constant 0 : index
    %c0_54 = arith.constant 0 : index
    %148 = vector.load %arg7[%c0_53, %c0_54] : memref<2x64xf32, #tpu.memory_space<vmem>>, vector<2x64xf32>
    tpu.vector_store %arg7[%c0_53, %c0_54], %147 {strides = array<i32>} : memref<2x64xf32, #tpu.memory_space<vmem>>, vector<2x64xf32>,
    %c1 = arith.constant 1 : index
    %c0_55 = arith.constant 0 : index
    %c0_56 = arith.constant 0 : index
    %149 = vector.load %arg4[%c1, %c0_55, %c0_56] : memref<8x2x64xf32, #tpu.memory_space<vmem>>, vector<1x2x32xf32>
    %150 = vector.shape_cast %149 : vector<1x2x32xf32> to vector<2x32xf32>
    %151 = vector.shape_cast %117 : vector<2x32xf32> to vector<1x2x32xf32>
    tpu.vector_store %arg4[%c1, %c0_55, %c0_56], %151 {strides = array<i32>} : memref<8x2x64xf32, #tpu.memory_space<vmem>>, vector<1x2x32xf32>,
    %c6 = arith.constant 6 : index
    %c0_57 = arith.constant 0 : index
    %c32_58 = arith.constant 32 : index
    %152 = vector.load %arg4[%c6, %c0_57, %c32_58] : memref<8x2x64xf32, #tpu.memory_space<vmem>>, vector<1x2x32xf32>
    %153 = vector.shape_cast %152 : vector<1x2x32xf32> to vector<2x32xf32>
    %154 = vector.shape_cast %144 : vector<2x32xf32> to vector<1x2x32xf32>
    tpu.vector_store %arg4[%c6, %c0_57, %c32_58], %154 {strides = array<i32>} : memref<8x2x64xf32, #tpu.memory_space<vmem>>, vector<1x2x32xf32>,
    %c0_59 = arith.constant 0 : index
    %c0_60 = arith.constant 0 : index
    %155 = vector.load %arg6[%c0_59, %c0_60] : memref<2x64xf32, #tpu.memory_space<vmem>>, vector<2x64xf32>
    %c0_61 = arith.constant 0 : index
    %c0_62 = arith.constant 0 : index
    %156 = vector.load %arg3[%c0_61, %c0_62] : memref<64x256xf32, #tpu.memory_space<vmem>>, vector<64x256xf32>
    %cst_63 = arith.constant dense<0.000000e+00> : vector<2x256xf32>
    %157 = tpu.matmul %155, %156, %cst_63 {dimension_numbers = #tpu.dot_dimension_numbers<[1], [0], [0], [1], [0, 0, 1, 1], [], []>} : vector<2x64xf32>, vector<64x256xf32>, vector<2x256xf32> -> vector<2x256xf32>
    %c4 = arith.constant 4 : index
    %c0_64 = arith.constant 0 : index
    %158 = vector.load %arg5[%c4, %c0_64] : memref<16x256xf32, #tpu.memory_space<vmem>>, vector<2x128xf32>
    %c10 = arith.constant 10 : index
    %c128_65 = arith.constant 128 : index
    %159 = vector.load %arg5[%c10, %c128_65] : memref<16x256xf32, #tpu.memory_space<vmem>>, vector<2x128xf32>
    %160 = tpu.concatenate %158, %159 in 1 : vector<2x128xf32>, vector<2x128xf32> -> vector<2x256xf32>
    %161 = arith.addf %160, %157 : vector<2x256xf32>
    %c0_66 = arith.constant 0 : index
    %c0_67 = arith.constant 0 : index
    %162 = vector.load %arg7[%c0_66, %c0_67] : memref<2x64xf32, #tpu.memory_space<vmem>>, vector<2x64xf32>
    %163 = vector.extract_strided_slice %161 {offsets = [0, 0], sizes = [2, 128], strides = [1, 1]} : vector<2x256xf32> to vector<2x128xf32>
    %164 = vector.extract_strided_slice %162 {offsets = [0, 0], sizes = [2, 32], strides = [1, 1]} : vector<2x64xf32> to vector<2x32xf32>
    %165 = vector.extract_strided_slice %163 {offsets = [0, 0], sizes = [2, 32], strides = [1, 1]} : vector<2x128xf32> to vector<2x32xf32>
    %166 = arith.negf %165 : vector<2x32xf32>
    %167 = math.exp %166 : vector<2x32xf32>
    %cst_68 = arith.constant 1.000000e+00 : f32
    %168 = vector.broadcast %cst_68 : f32 to vector<2x32xf32>
    %169 = arith.addf %168, %167 : vector<2x32xf32>
    %170 = arith.divf %168, %169 : vector<2x32xf32>
    %171 = vector.extract_strided_slice %163 {offsets = [0, 32], sizes = [2, 32], strides = [1, 1]} : vector<2x128xf32> to vector<2x32xf32>
    %172 = arith.negf %171 : vector<2x32xf32>
    %173 = math.exp %172 : vector<2x32xf32>
    %cst_69 = arith.constant 1.000000e+00 : f32
    %174 = vector.broadcast %cst_69 : f32 to vector<2x32xf32>
    %175 = arith.addf %174, %173 : vector<2x32xf32>
    %176 = arith.divf %174, %175 : vector<2x32xf32>
    %177 = vector.extract_strided_slice %163 {offsets = [0, 64], sizes = [2, 32], strides = [1, 1]} : vector<2x128xf32> to vector<2x32xf32>
    %178 = math.tanh %177 : vector<2x32xf32>
    %179 = vector.extract_strided_slice %163 {offsets = [0, 96], sizes = [2, 32], strides = [1, 1]} : vector<2x128xf32> to vector<2x32xf32>
    %180 = arith.negf %179 : vector<2x32xf32>
    %181 = math.exp %180 : vector<2x32xf32>
    %cst_70 = arith.constant 1.000000e+00 : f32
    %182 = vector.broadcast %cst_70 : f32 to vector<2x32xf32>
    %183 = arith.addf %182, %181 : vector<2x32xf32>
    %184 = arith.divf %182, %183 : vector<2x32xf32>
    %185 = arith.mulf %176, %164 : vector<2x32xf32>
    %186 = arith.mulf %170, %178 : vector<2x32xf32>
    %187 = arith.addf %185, %186 : vector<2x32xf32>
    %188 = math.tanh %187 : vector<2x32xf32>
    %189 = arith.mulf %184, %188 : vector<2x32xf32>
    %190 = vector.extract_strided_slice %161 {offsets = [0, 128], sizes = [2, 128], strides = [1, 1]} : vector<2x256xf32> to vector<2x128xf32>
    %191 = vector.extract_strided_slice %162 {offsets = [0, 32], sizes = [2, 32], strides = [1, 1]} : vector<2x64xf32> to vector<2x32xf32>
    %192 = vector.extract_strided_slice %190 {offsets = [0, 0], sizes = [2, 32], strides = [1, 1]} : vector<2x128xf32> to vector<2x32xf32>
    %193 = arith.negf %192 : vector<2x32xf32>
    %194 = math.exp %193 : vector<2x32xf32>
    %cst_71 = arith.constant 1.000000e+00 : f32
    %195 = vector.broadcast %cst_71 : f32 to vector<2x32xf32>
    %196 = arith.addf %195, %194 : vector<2x32xf32>
    %197 = arith.divf %195, %196 : vector<2x32xf32>
    %198 = vector.extract_strided_slice %190 {offsets = [0, 32], sizes = [2, 32], strides = [1, 1]} : vector<2x128xf32> to vector<2x32xf32>
    %199 = arith.negf %198 : vector<2x32xf32>
    %200 = math.exp %199 : vector<2x32xf32>
    %cst_72 = arith.constant 1.000000e+00 : f32
    %201 = vector.broadcast %cst_72 : f32 to vector<2x32xf32>
    %202 = arith.addf %201, %200 : vector<2x32xf32>
    %203 = arith.divf %201, %202 : vector<2x32xf32>
    %204 = vector.extract_strided_slice %190 {offsets = [0, 64], sizes = [2, 32], strides = [1, 1]} : vector<2x128xf32> to vector<2x32xf32>
    %205 = math.tanh %204 : vector<2x32xf32>
    %206 = vector.extract_strided_slice %190 {offsets = [0, 96], sizes = [2, 32], strides = [1, 1]} : vector<2x128xf32> to vector<2x32xf32>
    %207 = arith.negf %206 : vector<2x32xf32>
    %208 = math.exp %207 : vector<2x32xf32>
    %cst_73 = arith.constant 1.000000e+00 : f32
    %209 = vector.broadcast %cst_73 : f32 to vector<2x32xf32>
    %210 = arith.addf %209, %208 : vector<2x32xf32>
    %211 = arith.divf %209, %210 : vector<2x32xf32>
    %212 = arith.mulf %203, %191 : vector<2x32xf32>
    %213 = arith.mulf %197, %205 : vector<2x32xf32>
    %214 = arith.addf %212, %213 : vector<2x32xf32>
    %215 = math.tanh %214 : vector<2x32xf32>
    %216 = arith.mulf %211, %215 : vector<2x32xf32>
    %217 = tpu.concatenate %189, %216 in 1 : vector<2x32xf32>, vector<2x32xf32> -> vector<2x64xf32>
    %c0_74 = arith.constant 0 : index
    %c0_75 = arith.constant 0 : index
    %218 = vector.load %arg6[%c0_74, %c0_75] : memref<2x64xf32, #tpu.memory_space<vmem>>, vector<2x64xf32>
    tpu.vector_store %arg6[%c0_74, %c0_75], %217 {strides = array<i32>} : memref<2x64xf32, #tpu.memory_space<vmem>>, vector<2x64xf32>,
    %219 = tpu.concatenate %187, %214 in 1 : vector<2x32xf32>, vector<2x32xf32> -> vector<2x64xf32>
    %c0_76 = arith.constant 0 : index
    %c0_77 = arith.constant 0 : index
    %220 = vector.load %arg7[%c0_76, %c0_77] : memref<2x64xf32, #tpu.memory_space<vmem>>, vector<2x64xf32>
    tpu.vector_store %arg7[%c0_76, %c0_77], %219 {strides = array<i32>} : memref<2x64xf32, #tpu.memory_space<vmem>>, vector<2x64xf32>,
    %c2_78 = arith.constant 2 : index
    %c0_79 = arith.constant 0 : index
    %c0_80 = arith.constant 0 : index
    %221 = vector.load %arg4[%c2_78, %c0_79, %c0_80] : memref<8x2x64xf32, #tpu.memory_space<vmem>>, vector<1x2x32xf32>
    %222 = vector.shape_cast %221 : vector<1x2x32xf32> to vector<2x32xf32>
    %223 = vector.shape_cast %189 : vector<2x32xf32> to vector<1x2x32xf32>
    tpu.vector_store %arg4[%c2_78, %c0_79, %c0_80], %223 {strides = array<i32>} : memref<8x2x64xf32, #tpu.memory_space<vmem>>, vector<1x2x32xf32>,
    %c5 = arith.constant 5 : index
    %c0_81 = arith.constant 0 : index
    %c32_82 = arith.constant 32 : index
    %224 = vector.load %arg4[%c5, %c0_81, %c32_82] : memref<8x2x64xf32, #tpu.memory_space<vmem>>, vector<1x2x32xf32>
    %225 = vector.shape_cast %224 : vector<1x2x32xf32> to vector<2x32xf32>
    %226 = vector.shape_cast %216 : vector<2x32xf32> to vector<1x2x32xf32>
    tpu.vector_store %arg4[%c5, %c0_81, %c32_82], %226 {strides = array<i32>} : memref<8x2x64xf32, #tpu.memory_space<vmem>>, vector<1x2x32xf32>,
    %c0_83 = arith.constant 0 : index
    %c0_84 = arith.constant 0 : index
    %227 = vector.load %arg6[%c0_83, %c0_84] : memref<2x64xf32, #tpu.memory_space<vmem>>, vector<2x64xf32>
    %c0_85 = arith.constant 0 : index
    %c0_86 = arith.constant 0 : index
    %228 = vector.load %arg3[%c0_85, %c0_86] : memref<64x256xf32, #tpu.memory_space<vmem>>, vector<64x256xf32>
    %cst_87 = arith.constant dense<0.000000e+00> : vector<2x256xf32>
    %229 = tpu.matmul %227, %228, %cst_87 {dimension_numbers = #tpu.dot_dimension_numbers<[1], [0], [0], [1], [0, 0, 1, 1], [], []>} : vector<2x64xf32>, vector<64x256xf32>, vector<2x256xf32> -> vector<2x256xf32>
    %c6_88 = arith.constant 6 : index
    %c0_89 = arith.constant 0 : index
    %230 = vector.load %arg5[%c6_88, %c0_89] : memref<16x256xf32, #tpu.memory_space<vmem>>, vector<2x128xf32>
    %c8 = arith.constant 8 : index
    %c128_90 = arith.constant 128 : index
    %231 = vector.load %arg5[%c8, %c128_90] : memref<16x256xf32, #tpu.memory_space<vmem>>, vector<2x128xf32>
    %232 = tpu.concatenate %230, %231 in 1 : vector<2x128xf32>, vector<2x128xf32> -> vector<2x256xf32>
    %233 = arith.addf %232, %229 : vector<2x256xf32>
    %c0_91 = arith.constant 0 : index
    %c0_92 = arith.constant 0 : index
    %234 = vector.load %arg7[%c0_91, %c0_92] : memref<2x64xf32, #tpu.memory_space<vmem>>, vector<2x64xf32>
    %235 = vector.extract_strided_slice %233 {offsets = [0, 0], sizes = [2, 128], strides = [1, 1]} : vector<2x256xf32> to vector<2x128xf32>
    %236 = vector.extract_strided_slice %234 {offsets = [0, 0], sizes = [2, 32], strides = [1, 1]} : vector<2x64xf32> to vector<2x32xf32>
    %237 = vector.extract_strided_slice %235 {offsets = [0, 0], sizes = [2, 32], strides = [1, 1]} : vector<2x128xf32> to vector<2x32xf32>
    %238 = arith.negf %237 : vector<2x32xf32>
    %239 = math.exp %238 : vector<2x32xf32>
    %cst_93 = arith.constant 1.000000e+00 : f32
    %240 = vector.broadcast %cst_93 : f32 to vector<2x32xf32>
    %241 = arith.addf %240, %239 : vector<2x32xf32>
    %242 = arith.divf %240, %241 : vector<2x32xf32>
    %243 = vector.extract_strided_slice %235 {offsets = [0, 32], sizes = [2, 32], strides = [1, 1]} : vector<2x128xf32> to vector<2x32xf32>
    %244 = arith.negf %243 : vector<2x32xf32>
    %245 = math.exp %244 : vector<2x32xf32>
    %cst_94 = arith.constant 1.000000e+00 : f32
    %246 = vector.broadcast %cst_94 : f32 to vector<2x32xf32>
    %247 = arith.addf %246, %245 : vector<2x32xf32>
    %248 = arith.divf %246, %247 : vector<2x32xf32>
    %249 = vector.extract_strided_slice %235 {offsets = [0, 64], sizes = [2, 32], strides = [1, 1]} : vector<2x128xf32> to vector<2x32xf32>
    %250 = math.tanh %249 : vector<2x32xf32>
    %251 = vector.extract_strided_slice %235 {offsets = [0, 96], sizes = [2, 32], strides = [1, 1]} : vector<2x128xf32> to vector<2x32xf32>
    %252 = arith.negf %251 : vector<2x32xf32>
    %253 = math.exp %252 : vector<2x32xf32>
    %cst_95 = arith.constant 1.000000e+00 : f32
    %254 = vector.broadcast %cst_95 : f32 to vector<2x32xf32>
    %255 = arith.addf %254, %253 : vector<2x32xf32>
    %256 = arith.divf %254, %255 : vector<2x32xf32>
    %257 = arith.mulf %248, %236 : vector<2x32xf32>
    %258 = arith.mulf %242, %250 : vector<2x32xf32>
    %259 = arith.addf %257, %258 : vector<2x32xf32>
    %260 = math.tanh %259 : vector<2x32xf32>
    %261 = arith.mulf %256, %260 : vector<2x32xf32>
    %262 = vector.extract_strided_slice %233 {offsets = [0, 128], sizes = [2, 128], strides = [1, 1]} : vector<2x256xf32> to vector<2x128xf32>
    %263 = vector.extract_strided_slice %234 {offsets = [0, 32], sizes = [2, 32], strides = [1, 1]} : vector<2x64xf32> to vector<2x32xf32>
    %264 = vector.extract_strided_slice %262 {offsets = [0, 0], sizes = [2, 32], strides = [1, 1]} : vector<2x128xf32> to vector<2x32xf32>
    %265 = arith.negf %264 : vector<2x32xf32>
    %266 = math.exp %265 : vector<2x32xf32>
    %cst_96 = arith.constant 1.000000e+00 : f32
    %267 = vector.broadcast %cst_96 : f32 to vector<2x32xf32>
    %268 = arith.addf %267, %266 : vector<2x32xf32>
    %269 = arith.divf %267, %268 : vector<2x32xf32>
    %270 = vector.extract_strided_slice %262 {offsets = [0, 32], sizes = [2, 32], strides = [1, 1]} : vector<2x128xf32> to vector<2x32xf32>
    %271 = arith.negf %270 : vector<2x32xf32>
    %272 = math.exp %271 : vector<2x32xf32>
    %cst_97 = arith.constant 1.000000e+00 : f32
    %273 = vector.broadcast %cst_97 : f32 to vector<2x32xf32>
    %274 = arith.addf %273, %272 : vector<2x32xf32>
    %275 = arith.divf %273, %274 : vector<2x32xf32>
    %276 = vector.extract_strided_slice %262 {offsets = [0, 64], sizes = [2, 32], strides = [1, 1]} : vector<2x128xf32> to vector<2x32xf32>
    %277 = math.tanh %276 : vector<2x32xf32>
    %278 = vector.extract_strided_slice %262 {offsets = [0, 96], sizes = [2, 32], strides = [1, 1]} : vector<2x128xf32> to vector<2x32xf32>
    %279 = arith.negf %278 : vector<2x32xf32>
    %280 = math.exp %279 : vector<2x32xf32>
    %cst_98 = arith.constant 1.000000e+00 : f32
    %281 = vector.broadcast %cst_98 : f32 to vector<2x32xf32>
    %282 = arith.addf %281, %280 : vector<2x32xf32>
    %283 = arith.divf %281, %282 : vector<2x32xf32>
    %284 = arith.mulf %275, %263 : vector<2x32xf32>
    %285 = arith.mulf %269, %277 : vector<2x32xf32>
    %286 = arith.addf %284, %285 : vector<2x32xf32>
    %287 = math.tanh %286 : vector<2x32xf32>
    %288 = arith.mulf %283, %287 : vector<2x32xf32>
    %289 = tpu.concatenate %261, %288 in 1 : vector<2x32xf32>, vector<2x32xf32> -> vector<2x64xf32>
    %c0_99 = arith.constant 0 : index
    %c0_100 = arith.constant 0 : index
    %290 = vector.load %arg6[%c0_99, %c0_100] : memref<2x64xf32, #tpu.memory_space<vmem>>, vector<2x64xf32>
    tpu.vector_store %arg6[%c0_99, %c0_100], %289 {strides = array<i32>} : memref<2x64xf32, #tpu.memory_space<vmem>>, vector<2x64xf32>,
    %291 = tpu.concatenate %259, %286 in 1 : vector<2x32xf32>, vector<2x32xf32> -> vector<2x64xf32>
    %c0_101 = arith.constant 0 : index
    %c0_102 = arith.constant 0 : index
    %292 = vector.load %arg7[%c0_101, %c0_102] : memref<2x64xf32, #tpu.memory_space<vmem>>, vector<2x64xf32>
    tpu.vector_store %arg7[%c0_101, %c0_102], %291 {strides = array<i32>} : memref<2x64xf32, #tpu.memory_space<vmem>>, vector<2x64xf32>,
    %c3 = arith.constant 3 : index
    %c0_103 = arith.constant 0 : index
    %c0_104 = arith.constant 0 : index
    %293 = vector.load %arg4[%c3, %c0_103, %c0_104] : memref<8x2x64xf32, #tpu.memory_space<vmem>>, vector<1x2x32xf32>
    %294 = vector.shape_cast %293 : vector<1x2x32xf32> to vector<2x32xf32>
    %295 = vector.shape_cast %261 : vector<2x32xf32> to vector<1x2x32xf32>
    tpu.vector_store %arg4[%c3, %c0_103, %c0_104], %295 {strides = array<i32>} : memref<8x2x64xf32, #tpu.memory_space<vmem>>, vector<1x2x32xf32>,
    %c4_105 = arith.constant 4 : index
    %c0_106 = arith.constant 0 : index
    %c32_107 = arith.constant 32 : index
    %296 = vector.load %arg4[%c4_105, %c0_106, %c32_107] : memref<8x2x64xf32, #tpu.memory_space<vmem>>, vector<1x2x32xf32>
    %297 = vector.shape_cast %296 : vector<1x2x32xf32> to vector<2x32xf32>
    %298 = vector.shape_cast %288 : vector<2x32xf32> to vector<1x2x32xf32>
    tpu.vector_store %arg4[%c4_105, %c0_106, %c32_107], %298 {strides = array<i32>} : memref<8x2x64xf32, #tpu.memory_space<vmem>>, vector<1x2x32xf32>,
    %c0_108 = arith.constant 0 : index
    %c0_109 = arith.constant 0 : index
    %299 = vector.load %arg6[%c0_108, %c0_109] : memref<2x64xf32, #tpu.memory_space<vmem>>, vector<2x64xf32>
    %c0_110 = arith.constant 0 : index
    %c0_111 = arith.constant 0 : index
    %300 = vector.load %arg3[%c0_110, %c0_111] : memref<64x256xf32, #tpu.memory_space<vmem>>, vector<64x256xf32>
    %cst_112 = arith.constant dense<0.000000e+00> : vector<2x256xf32>
    %301 = tpu.matmul %299, %300, %cst_112 {dimension_numbers = #tpu.dot_dimension_numbers<[1], [0], [0], [1], [0, 0, 1, 1], [], []>} : vector<2x64xf32>, vector<64x256xf32>, vector<2x256xf32> -> vector<2x256xf32>
    %c8_113 = arith.constant 8 : index
    %c0_114 = arith.constant 0 : index
    %302 = vector.load %arg5[%c8_113, %c0_114] : memref<16x256xf32, #tpu.memory_space<vmem>>, vector<2x128xf32>
    %c6_115 = arith.constant 6 : index
    %c128_116 = arith.constant 128 : index
    %303 = vector.load %arg5[%c6_115, %c128_116] : memref<16x256xf32, #tpu.memory_space<vmem>>, vector<2x128xf32>
    %304 = tpu.concatenate %302, %303 in 1 : vector<2x128xf32>, vector<2x128xf32> -> vector<2x256xf32>
    %305 = arith.addf %304, %301 : vector<2x256xf32>
    %c0_117 = arith.constant 0 : index
    %c0_118 = arith.constant 0 : index
    %306 = vector.load %arg7[%c0_117, %c0_118] : memref<2x64xf32, #tpu.memory_space<vmem>>, vector<2x64xf32>
    %307 = vector.extract_strided_slice %305 {offsets = [0, 0], sizes = [2, 128], strides = [1, 1]} : vector<2x256xf32> to vector<2x128xf32>
    %308 = vector.extract_strided_slice %306 {offsets = [0, 0], sizes = [2, 32], strides = [1, 1]} : vector<2x64xf32> to vector<2x32xf32>
    %309 = vector.extract_strided_slice %307 {offsets = [0, 0], sizes = [2, 32], strides = [1, 1]} : vector<2x128xf32> to vector<2x32xf32>
    %310 = arith.negf %309 : vector<2x32xf32>
    %311 = math.exp %310 : vector<2x32xf32>
    %cst_119 = arith.constant 1.000000e+00 : f32
    %312 = vector.broadcast %cst_119 : f32 to vector<2x32xf32>
    %313 = arith.addf %312, %311 : vector<2x32xf32>
    %314 = arith.divf %312, %313 : vector<2x32xf32>
    %315 = vector.extract_strided_slice %307 {offsets = [0, 32], sizes = [2, 32], strides = [1, 1]} : vector<2x128xf32> to vector<2x32xf32>
    %316 = arith.negf %315 : vector<2x32xf32>
    %317 = math.exp %316 : vector<2x32xf32>
    %cst_120 = arith.constant 1.000000e+00 : f32
    %318 = vector.broadcast %cst_120 : f32 to vector<2x32xf32>
    %319 = arith.addf %318, %317 : vector<2x32xf32>
    %320 = arith.divf %318, %319 : vector<2x32xf32>
    %321 = vector.extract_strided_slice %307 {offsets = [0, 64], sizes = [2, 32], strides = [1, 1]} : vector<2x128xf32> to vector<2x32xf32>
    %322 = math.tanh %321 : vector<2x32xf32>
    %323 = vector.extract_strided_slice %307 {offsets = [0, 96], sizes = [2, 32], strides = [1, 1]} : vector<2x128xf32> to vector<2x32xf32>
    %324 = arith.negf %323 : vector<2x32xf32>
    %325 = math.exp %324 : vector<2x32xf32>
    %cst_121 = arith.constant 1.000000e+00 : f32
    %326 = vector.broadcast %cst_121 : f32 to vector<2x32xf32>
    %327 = arith.addf %326, %325 : vector<2x32xf32>
    %328 = arith.divf %326, %327 : vector<2x32xf32>
    %329 = arith.mulf %320, %308 : vector<2x32xf32>
    %330 = arith.mulf %314, %322 : vector<2x32xf32>
    %331 = arith.addf %329, %330 : vector<2x32xf32>
    %332 = math.tanh %331 : vector<2x32xf32>
    %333 = arith.mulf %328, %332 : vector<2x32xf32>
    %334 = vector.extract_strided_slice %305 {offsets = [0, 128], sizes = [2, 128], strides = [1, 1]} : vector<2x256xf32> to vector<2x128xf32>
    %335 = vector.extract_strided_slice %306 {offsets = [0, 32], sizes = [2, 32], strides = [1, 1]} : vector<2x64xf32> to vector<2x32xf32>
    %336 = vector.extract_strided_slice %334 {offsets = [0, 0], sizes = [2, 32], strides = [1, 1]} : vector<2x128xf32> to vector<2x32xf32>
    %337 = arith.negf %336 : vector<2x32xf32>
    %338 = math.exp %337 : vector<2x32xf32>
    %cst_122 = arith.constant 1.000000e+00 : f32
    %339 = vector.broadcast %cst_122 : f32 to vector<2x32xf32>
    %340 = arith.addf %339, %338 : vector<2x32xf32>
    %341 = arith.divf %339, %340 : vector<2x32xf32>
    %342 = vector.extract_strided_slice %334 {offsets = [0, 32], sizes = [2, 32], strides = [1, 1]} : vector<2x128xf32> to vector<2x32xf32>
    %343 = arith.negf %342 : vector<2x32xf32>
    %344 = math.exp %343 : vector<2x32xf32>
    %cst_123 = arith.constant 1.000000e+00 : f32
    %345 = vector.broadcast %cst_123 : f32 to vector<2x32xf32>
    %346 = arith.addf %345, %344 : vector<2x32xf32>
    %347 = arith.divf %345, %346 : vector<2x32xf32>
    %348 = vector.extract_strided_slice %334 {offsets = [0, 64], sizes = [2, 32], strides = [1, 1]} : vector<2x128xf32> to vector<2x32xf32>
    %349 = math.tanh %348 : vector<2x32xf32>
    %350 = vector.extract_strided_slice %334 {offsets = [0, 96], sizes = [2, 32], strides = [1, 1]} : vector<2x128xf32> to vector<2x32xf32>
    %351 = arith.negf %350 : vector<2x32xf32>
    %352 = math.exp %351 : vector<2x32xf32>
    %cst_124 = arith.constant 1.000000e+00 : f32
    %353 = vector.broadcast %cst_124 : f32 to vector<2x32xf32>
    %354 = arith.addf %353, %352 : vector<2x32xf32>
    %355 = arith.divf %353, %354 : vector<2x32xf32>
    %356 = arith.mulf %347, %335 : vector<2x32xf32>
    %357 = arith.mulf %341, %349 : vector<2x32xf32>
    %358 = arith.addf %356, %357 : vector<2x32xf32>
    %359 = math.tanh %358 : vector<2x32xf32>
    %360 = arith.mulf %355, %359 : vector<2x32xf32>
    %361 = tpu.concatenate %333, %360 in 1 : vector<2x32xf32>, vector<2x32xf32> -> vector<2x64xf32>
    %c0_125 = arith.constant 0 : index
    %c0_126 = arith.constant 0 : index
    %362 = vector.load %arg6[%c0_125, %c0_126] : memref<2x64xf32, #tpu.memory_space<vmem>>, vector<2x64xf32>
    tpu.vector_store %arg6[%c0_125, %c0_126], %361 {strides = array<i32>} : memref<2x64xf32, #tpu.memory_space<vmem>>, vector<2x64xf32>,
    %363 = tpu.concatenate %331, %358 in 1 : vector<2x32xf32>, vector<2x32xf32> -> vector<2x64xf32>
    %c0_127 = arith.constant 0 : index
    %c0_128 = arith.constant 0 : index
    %364 = vector.load %arg7[%c0_127, %c0_128] : memref<2x64xf32, #tpu.memory_space<vmem>>, vector<2x64xf32>
    tpu.vector_store %arg7[%c0_127, %c0_128], %363 {strides = array<i32>} : memref<2x64xf32, #tpu.memory_space<vmem>>, vector<2x64xf32>,
    %c4_129 = arith.constant 4 : index
    %c0_130 = arith.constant 0 : index
    %c0_131 = arith.constant 0 : index
    %365 = vector.load %arg4[%c4_129, %c0_130, %c0_131] : memref<8x2x64xf32, #tpu.memory_space<vmem>>, vector<1x2x32xf32>
    %366 = vector.shape_cast %365 : vector<1x2x32xf32> to vector<2x32xf32>
    %367 = vector.shape_cast %333 : vector<2x32xf32> to vector<1x2x32xf32>
    tpu.vector_store %arg4[%c4_129, %c0_130, %c0_131], %367 {strides = array<i32>} : memref<8x2x64xf32, #tpu.memory_space<vmem>>, vector<1x2x32xf32>,
    %c3_132 = arith.constant 3 : index
    %c0_133 = arith.constant 0 : index
    %c32_134 = arith.constant 32 : index
    %368 = vector.load %arg4[%c3_132, %c0_133, %c32_134] : memref<8x2x64xf32, #tpu.memory_space<vmem>>, vector<1x2x32xf32>
    %369 = vector.shape_cast %368 : vector<1x2x32xf32> to vector<2x32xf32>
    %370 = vector.shape_cast %360 : vector<2x32xf32> to vector<1x2x32xf32>
    tpu.vector_store %arg4[%c3_132, %c0_133, %c32_134], %370 {strides = array<i32>} : memref<8x2x64xf32, #tpu.memory_space<vmem>>, vector<1x2x32xf32>,
    %c0_135 = arith.constant 0 : index
    %c0_136 = arith.constant 0 : index
    %371 = vector.load %arg6[%c0_135, %c0_136] : memref<2x64xf32, #tpu.memory_space<vmem>>, vector<2x64xf32>
    %c0_137 = arith.constant 0 : index
    %c0_138 = arith.constant 0 : index
    %372 = vector.load %arg3[%c0_137, %c0_138] : memref<64x256xf32, #tpu.memory_space<vmem>>, vector<64x256xf32>
    %cst_139 = arith.constant dense<0.000000e+00> : vector<2x256xf32>
    %373 = tpu.matmul %371, %372, %cst_139 {dimension_numbers = #tpu.dot_dimension_numbers<[1], [0], [0], [1], [0, 0, 1, 1], [], []>} : vector<2x64xf32>, vector<64x256xf32>, vector<2x256xf32> -> vector<2x256xf32>
    %c10_140 = arith.constant 10 : index
    %c0_141 = arith.constant 0 : index
    %374 = vector.load %arg5[%c10_140, %c0_141] : memref<16x256xf32, #tpu.memory_space<vmem>>, vector<2x128xf32>
    %c4_142 = arith.constant 4 : index
    %c128_143 = arith.constant 128 : index
    %375 = vector.load %arg5[%c4_142, %c128_143] : memref<16x256xf32, #tpu.memory_space<vmem>>, vector<2x128xf32>
    %376 = tpu.concatenate %374, %375 in 1 : vector<2x128xf32>, vector<2x128xf32> -> vector<2x256xf32>
    %377 = arith.addf %376, %373 : vector<2x256xf32>
    %c0_144 = arith.constant 0 : index
    %c0_145 = arith.constant 0 : index
    %378 = vector.load %arg7[%c0_144, %c0_145] : memref<2x64xf32, #tpu.memory_space<vmem>>, vector<2x64xf32>
    %379 = vector.extract_strided_slice %377 {offsets = [0, 0], sizes = [2, 128], strides = [1, 1]} : vector<2x256xf32> to vector<2x128xf32>
    %380 = vector.extract_strided_slice %378 {offsets = [0, 0], sizes = [2, 32], strides = [1, 1]} : vector<2x64xf32> to vector<2x32xf32>
    %381 = vector.extract_strided_slice %379 {offsets = [0, 0], sizes = [2, 32], strides = [1, 1]} : vector<2x128xf32> to vector<2x32xf32>
    %382 = arith.negf %381 : vector<2x32xf32>
    %383 = math.exp %382 : vector<2x32xf32>
    %cst_146 = arith.constant 1.000000e+00 : f32
    %384 = vector.broadcast %cst_146 : f32 to vector<2x32xf32>
    %385 = arith.addf %384, %383 : vector<2x32xf32>
    %386 = arith.divf %384, %385 : vector<2x32xf32>
    %387 = vector.extract_strided_slice %379 {offsets = [0, 32], sizes = [2, 32], strides = [1, 1]} : vector<2x128xf32> to vector<2x32xf32>
    %388 = arith.negf %387 : vector<2x32xf32>
    %389 = math.exp %388 : vector<2x32xf32>
    %cst_147 = arith.constant 1.000000e+00 : f32
    %390 = vector.broadcast %cst_147 : f32 to vector<2x32xf32>
    %391 = arith.addf %390, %389 : vector<2x32xf32>
    %392 = arith.divf %390, %391 : vector<2x32xf32>
    %393 = vector.extract_strided_slice %379 {offsets = [0, 64], sizes = [2, 32], strides = [1, 1]} : vector<2x128xf32> to vector<2x32xf32>
    %394 = math.tanh %393 : vector<2x32xf32>
    %395 = vector.extract_strided_slice %379 {offsets = [0, 96], sizes = [2, 32], strides = [1, 1]} : vector<2x128xf32> to vector<2x32xf32>
    %396 = arith.negf %395 : vector<2x32xf32>
    %397 = math.exp %396 : vector<2x32xf32>
    %cst_148 = arith.constant 1.000000e+00 : f32
    %398 = vector.broadcast %cst_148 : f32 to vector<2x32xf32>
    %399 = arith.addf %398, %397 : vector<2x32xf32>
    %400 = arith.divf %398, %399 : vector<2x32xf32>
    %401 = arith.mulf %392, %380 : vector<2x32xf32>
    %402 = arith.mulf %386, %394 : vector<2x32xf32>
    %403 = arith.addf %401, %402 : vector<2x32xf32>
    %404 = math.tanh %403 : vector<2x32xf32>
    %405 = arith.mulf %400, %404 : vector<2x32xf32>
    %406 = vector.extract_strided_slice %377 {offsets = [0, 128], sizes = [2, 128], strides = [1, 1]} : vector<2x256xf32> to vector<2x128xf32>
    %407 = vector.extract_strided_slice %378 {offsets = [0, 32], sizes = [2, 32], strides = [1, 1]} : vector<2x64xf32> to vector<2x32xf32>
    %408 = vector.extract_strided_slice %406 {offsets = [0, 0], sizes = [2, 32], strides = [1, 1]} : vector<2x128xf32> to vector<2x32xf32>
    %409 = arith.negf %408 : vector<2x32xf32>
    %410 = math.exp %409 : vector<2x32xf32>
    %cst_149 = arith.constant 1.000000e+00 : f32
    %411 = vector.broadcast %cst_149 : f32 to vector<2x32xf32>
    %412 = arith.addf %411, %410 : vector<2x32xf32>
    %413 = arith.divf %411, %412 : vector<2x32xf32>
    %414 = vector.extract_strided_slice %406 {offsets = [0, 32], sizes = [2, 32], strides = [1, 1]} : vector<2x128xf32> to vector<2x32xf32>
    %415 = arith.negf %414 : vector<2x32xf32>
    %416 = math.exp %415 : vector<2x32xf32>
    %cst_150 = arith.constant 1.000000e+00 : f32
    %417 = vector.broadcast %cst_150 : f32 to vector<2x32xf32>
    %418 = arith.addf %417, %416 : vector<2x32xf32>
    %419 = arith.divf %417, %418 : vector<2x32xf32>
    %420 = vector.extract_strided_slice %406 {offsets = [0, 64], sizes = [2, 32], strides = [1, 1]} : vector<2x128xf32> to vector<2x32xf32>
    %421 = math.tanh %420 : vector<2x32xf32>
    %422 = vector.extract_strided_slice %406 {offsets = [0, 96], sizes = [2, 32], strides = [1, 1]} : vector<2x128xf32> to vector<2x32xf32>
    %423 = arith.negf %422 : vector<2x32xf32>
    %424 = math.exp %423 : vector<2x32xf32>
    %cst_151 = arith.constant 1.000000e+00 : f32
    %425 = vector.broadcast %cst_151 : f32 to vector<2x32xf32>
    %426 = arith.addf %425, %424 : vector<2x32xf32>
    %427 = arith.divf %425, %426 : vector<2x32xf32>
    %428 = arith.mulf %419, %407 : vector<2x32xf32>
    %429 = arith.mulf %413, %421 : vector<2x32xf32>
    %430 = arith.addf %428, %429 : vector<2x32xf32>
    %431 = math.tanh %430 : vector<2x32xf32>
    %432 = arith.mulf %427, %431 : vector<2x32xf32>
    %433 = tpu.concatenate %405, %432 in 1 : vector<2x32xf32>, vector<2x32xf32> -> vector<2x64xf32>
    %c0_152 = arith.constant 0 : index
    %c0_153 = arith.constant 0 : index
    %434 = vector.load %arg6[%c0_152, %c0_153] : memref<2x64xf32, #tpu.memory_space<vmem>>, vector<2x64xf32>
    tpu.vector_store %arg6[%c0_152, %c0_153], %433 {strides = array<i32>} : memref<2x64xf32, #tpu.memory_space<vmem>>, vector<2x64xf32>,
    %435 = tpu.concatenate %403, %430 in 1 : vector<2x32xf32>, vector<2x32xf32> -> vector<2x64xf32>
    %c0_154 = arith.constant 0 : index
    %c0_155 = arith.constant 0 : index
    %436 = vector.load %arg7[%c0_154, %c0_155] : memref<2x64xf32, #tpu.memory_space<vmem>>, vector<2x64xf32>
    tpu.vector_store %arg7[%c0_154, %c0_155], %435 {strides = array<i32>} : memref<2x64xf32, #tpu.memory_space<vmem>>, vector<2x64xf32>,
    %c5_156 = arith.constant 5 : index
    %c0_157 = arith.constant 0 : index
    %c0_158 = arith.constant 0 : index
    %437 = vector.load %arg4[%c5_156, %c0_157, %c0_158] : memref<8x2x64xf32, #tpu.memory_space<vmem>>, vector<1x2x32xf32>
    %438 = vector.shape_cast %437 : vector<1x2x32xf32> to vector<2x32xf32>
    %439 = vector.shape_cast %405 : vector<2x32xf32> to vector<1x2x32xf32>
    tpu.vector_store %arg4[%c5_156, %c0_157, %c0_158], %439 {strides = array<i32>} : memref<8x2x64xf32, #tpu.memory_space<vmem>>, vector<1x2x32xf32>,
    %c2_159 = arith.constant 2 : index
    %c0_160 = arith.constant 0 : index
    %c32_161 = arith.constant 32 : index
    %440 = vector.load %arg4[%c2_159, %c0_160, %c32_161] : memref<8x2x64xf32, #tpu.memory_space<vmem>>, vector<1x2x32xf32>
    %441 = vector.shape_cast %440 : vector<1x2x32xf32> to vector<2x32xf32>
    %442 = vector.shape_cast %432 : vector<2x32xf32> to vector<1x2x32xf32>
    tpu.vector_store %arg4[%c2_159, %c0_160, %c32_161], %442 {strides = array<i32>} : memref<8x2x64xf32, #tpu.memory_space<vmem>>, vector<1x2x32xf32>,
    %c0_162 = arith.constant 0 : index
    %c0_163 = arith.constant 0 : index
    %443 = vector.load %arg6[%c0_162, %c0_163] : memref<2x64xf32, #tpu.memory_space<vmem>>, vector<2x64xf32>
    %c0_164 = arith.constant 0 : index
    %c0_165 = arith.constant 0 : index
    %444 = vector.load %arg3[%c0_164, %c0_165] : memref<64x256xf32, #tpu.memory_space<vmem>>, vector<64x256xf32>
    %cst_166 = arith.constant dense<0.000000e+00> : vector<2x256xf32>
    %445 = tpu.matmul %443, %444, %cst_166 {dimension_numbers = #tpu.dot_dimension_numbers<[1], [0], [0], [1], [0, 0, 1, 1], [], []>} : vector<2x64xf32>, vector<64x256xf32>, vector<2x256xf32> -> vector<2x256xf32>
    %c12_167 = arith.constant 12 : index
    %c0_168 = arith.constant 0 : index
    %446 = vector.load %arg5[%c12_167, %c0_168] : memref<16x256xf32, #tpu.memory_space<vmem>>, vector<2x128xf32>
    %c2_169 = arith.constant 2 : index
    %c128_170 = arith.constant 128 : index
    %447 = vector.load %arg5[%c2_169, %c128_170] : memref<16x256xf32, #tpu.memory_space<vmem>>, vector<2x128xf32>
    %448 = tpu.concatenate %446, %447 in 1 : vector<2x128xf32>, vector<2x128xf32> -> vector<2x256xf32>
    %449 = arith.addf %448, %445 : vector<2x256xf32>
    %c0_171 = arith.constant 0 : index
    %c0_172 = arith.constant 0 : index
    %450 = vector.load %arg7[%c0_171, %c0_172] : memref<2x64xf32, #tpu.memory_space<vmem>>, vector<2x64xf32>
    %451 = vector.extract_strided_slice %449 {offsets = [0, 0], sizes = [2, 128], strides = [1, 1]} : vector<2x256xf32> to vector<2x128xf32>
    %452 = vector.extract_strided_slice %450 {offsets = [0, 0], sizes = [2, 32], strides = [1, 1]} : vector<2x64xf32> to vector<2x32xf32>
    %453 = vector.extract_strided_slice %451 {offsets = [0, 0], sizes = [2, 32], strides = [1, 1]} : vector<2x128xf32> to vector<2x32xf32>
    %454 = arith.negf %453 : vector<2x32xf32>
    %455 = math.exp %454 : vector<2x32xf32>
    %cst_173 = arith.constant 1.000000e+00 : f32
    %456 = vector.broadcast %cst_173 : f32 to vector<2x32xf32>
    %457 = arith.addf %456, %455 : vector<2x32xf32>
    %458 = arith.divf %456, %457 : vector<2x32xf32>
    %459 = vector.extract_strided_slice %451 {offsets = [0, 32], sizes = [2, 32], strides = [1, 1]} : vector<2x128xf32> to vector<2x32xf32>
    %460 = arith.negf %459 : vector<2x32xf32>
    %461 = math.exp %460 : vector<2x32xf32>
    %cst_174 = arith.constant 1.000000e+00 : f32
    %462 = vector.broadcast %cst_174 : f32 to vector<2x32xf32>
    %463 = arith.addf %462, %461 : vector<2x32xf32>
    %464 = arith.divf %462, %463 : vector<2x32xf32>
    %465 = vector.extract_strided_slice %451 {offsets = [0, 64], sizes = [2, 32], strides = [1, 1]} : vector<2x128xf32> to vector<2x32xf32>
    %466 = math.tanh %465 : vector<2x32xf32>
    %467 = vector.extract_strided_slice %451 {offsets = [0, 96], sizes = [2, 32], strides = [1, 1]} : vector<2x128xf32> to vector<2x32xf32>
    %468 = arith.negf %467 : vector<2x32xf32>
    %469 = math.exp %468 : vector<2x32xf32>
    %cst_175 = arith.constant 1.000000e+00 : f32
    %470 = vector.broadcast %cst_175 : f32 to vector<2x32xf32>
    %471 = arith.addf %470, %469 : vector<2x32xf32>
    %472 = arith.divf %470, %471 : vector<2x32xf32>
    %473 = arith.mulf %464, %452 : vector<2x32xf32>
    %474 = arith.mulf %458, %466 : vector<2x32xf32>
    %475 = arith.addf %473, %474 : vector<2x32xf32>
    %476 = math.tanh %475 : vector<2x32xf32>
    %477 = arith.mulf %472, %476 : vector<2x32xf32>
    %478 = vector.extract_strided_slice %449 {offsets = [0, 128], sizes = [2, 128], strides = [1, 1]} : vector<2x256xf32> to vector<2x128xf32>
    %479 = vector.extract_strided_slice %450 {offsets = [0, 32], sizes = [2, 32], strides = [1, 1]} : vector<2x64xf32> to vector<2x32xf32>
    %480 = vector.extract_strided_slice %478 {offsets = [0, 0], sizes = [2, 32], strides = [1, 1]} : vector<2x128xf32> to vector<2x32xf32>
    %481 = arith.negf %480 : vector<2x32xf32>
    %482 = math.exp %481 : vector<2x32xf32>
    %cst_176 = arith.constant 1.000000e+00 : f32
    %483 = vector.broadcast %cst_176 : f32 to vector<2x32xf32>
    %484 = arith.addf %483, %482 : vector<2x32xf32>
    %485 = arith.divf %483, %484 : vector<2x32xf32>
    %486 = vector.extract_strided_slice %478 {offsets = [0, 32], sizes = [2, 32], strides = [1, 1]} : vector<2x128xf32> to vector<2x32xf32>
    %487 = arith.negf %486 : vector<2x32xf32>
    %488 = math.exp %487 : vector<2x32xf32>
    %cst_177 = arith.constant 1.000000e+00 : f32
    %489 = vector.broadcast %cst_177 : f32 to vector<2x32xf32>
    %490 = arith.addf %489, %488 : vector<2x32xf32>
    %491 = arith.divf %489, %490 : vector<2x32xf32>
    %492 = vector.extract_strided_slice %478 {offsets = [0, 64], sizes = [2, 32], strides = [1, 1]} : vector<2x128xf32> to vector<2x32xf32>
    %493 = math.tanh %492 : vector<2x32xf32>
    %494 = vector.extract_strided_slice %478 {offsets = [0, 96], sizes = [2, 32], strides = [1, 1]} : vector<2x128xf32> to vector<2x32xf32>
    %495 = arith.negf %494 : vector<2x32xf32>
    %496 = math.exp %495 : vector<2x32xf32>
    %cst_178 = arith.constant 1.000000e+00 : f32
    %497 = vector.broadcast %cst_178 : f32 to vector<2x32xf32>
    %498 = arith.addf %497, %496 : vector<2x32xf32>
    %499 = arith.divf %497, %498 : vector<2x32xf32>
    %500 = arith.mulf %491, %479 : vector<2x32xf32>
    %501 = arith.mulf %485, %493 : vector<2x32xf32>
    %502 = arith.addf %500, %501 : vector<2x32xf32>
    %503 = math.tanh %502 : vector<2x32xf32>
    %504 = arith.mulf %499, %503 : vector<2x32xf32>
    %505 = tpu.concatenate %477, %504 in 1 : vector<2x32xf32>, vector<2x32xf32> -> vector<2x64xf32>
    %c0_179 = arith.constant 0 : index
    %c0_180 = arith.constant 0 : index
    %506 = vector.load %arg6[%c0_179, %c0_180] : memref<2x64xf32, #tpu.memory_space<vmem>>, vector<2x64xf32>
    tpu.vector_store %arg6[%c0_179, %c0_180], %505 {strides = array<i32>} : memref<2x64xf32, #tpu.memory_space<vmem>>, vector<2x64xf32>,
    %507 = tpu.concatenate %475, %502 in 1 : vector<2x32xf32>, vector<2x32xf32> -> vector<2x64xf32>
    %c0_181 = arith.constant 0 : index
    %c0_182 = arith.constant 0 : index
    %508 = vector.load %arg7[%c0_181, %c0_182] : memref<2x64xf32, #tpu.memory_space<vmem>>, vector<2x64xf32>
    tpu.vector_store %arg7[%c0_181, %c0_182], %507 {strides = array<i32>} : memref<2x64xf32, #tpu.memory_space<vmem>>, vector<2x64xf32>,
    %c6_183 = arith.constant 6 : index
    %c0_184 = arith.constant 0 : index
    %c0_185 = arith.constant 0 : index
    %509 = vector.load %arg4[%c6_183, %c0_184, %c0_185] : memref<8x2x64xf32, #tpu.memory_space<vmem>>, vector<1x2x32xf32>
    %510 = vector.shape_cast %509 : vector<1x2x32xf32> to vector<2x32xf32>
    %511 = vector.shape_cast %477 : vector<2x32xf32> to vector<1x2x32xf32>
    tpu.vector_store %arg4[%c6_183, %c0_184, %c0_185], %511 {strides = array<i32>} : memref<8x2x64xf32, #tpu.memory_space<vmem>>, vector<1x2x32xf32>,
    %c1_186 = arith.constant 1 : index
    %c0_187 = arith.constant 0 : index
    %c32_188 = arith.constant 32 : index
    %512 = vector.load %arg4[%c1_186, %c0_187, %c32_188] : memref<8x2x64xf32, #tpu.memory_space<vmem>>, vector<1x2x32xf32>
    %513 = vector.shape_cast %512 : vector<1x2x32xf32> to vector<2x32xf32>
    %514 = vector.shape_cast %504 : vector<2x32xf32> to vector<1x2x32xf32>
    tpu.vector_store %arg4[%c1_186, %c0_187, %c32_188], %514 {strides = array<i32>} : memref<8x2x64xf32, #tpu.memory_space<vmem>>, vector<1x2x32xf32>,
    %c0_189 = arith.constant 0 : index
    %c0_190 = arith.constant 0 : index
    %515 = vector.load %arg6[%c0_189, %c0_190] : memref<2x64xf32, #tpu.memory_space<vmem>>, vector<2x64xf32>
    %c0_191 = arith.constant 0 : index
    %c0_192 = arith.constant 0 : index
    %516 = vector.load %arg3[%c0_191, %c0_192] : memref<64x256xf32, #tpu.memory_space<vmem>>, vector<64x256xf32>
    %cst_193 = arith.constant dense<0.000000e+00> : vector<2x256xf32>
    %517 = tpu.matmul %515, %516, %cst_193 {dimension_numbers = #tpu.dot_dimension_numbers<[1], [0], [0], [1], [0, 0, 1, 1], [], []>} : vector<2x64xf32>, vector<64x256xf32>, vector<2x256xf32> -> vector<2x256xf32>
    %c14_194 = arith.constant 14 : index
    %c0_195 = arith.constant 0 : index
    %518 = vector.load %arg5[%c14_194, %c0_195] : memref<16x256xf32, #tpu.memory_space<vmem>>, vector<2x128xf32>
    %c0_196 = arith.constant 0 : index
    %c128_197 = arith.constant 128 : index
    %519 = vector.load %arg5[%c0_196, %c128_197] : memref<16x256xf32, #tpu.memory_space<vmem>>, vector<2x128xf32>
    %520 = tpu.concatenate %518, %519 in 1 : vector<2x128xf32>, vector<2x128xf32> -> vector<2x256xf32>
    %521 = arith.addf %520, %517 : vector<2x256xf32>
    %c0_198 = arith.constant 0 : index
    %c0_199 = arith.constant 0 : index
    %522 = vector.load %arg7[%c0_198, %c0_199] : memref<2x64xf32, #tpu.memory_space<vmem>>, vector<2x64xf32>
    %523 = vector.extract_strided_slice %521 {offsets = [0, 0], sizes = [2, 128], strides = [1, 1]} : vector<2x256xf32> to vector<2x128xf32>
    %524 = vector.extract_strided_slice %522 {offsets = [0, 0], sizes = [2, 32], strides = [1, 1]} : vector<2x64xf32> to vector<2x32xf32>
    %525 = vector.extract_strided_slice %523 {offsets = [0, 0], sizes = [2, 32], strides = [1, 1]} : vector<2x128xf32> to vector<2x32xf32>
    %526 = arith.negf %525 : vector<2x32xf32>
    %527 = math.exp %526 : vector<2x32xf32>
    %cst_200 = arith.constant 1.000000e+00 : f32
    %528 = vector.broadcast %cst_200 : f32 to vector<2x32xf32>
    %529 = arith.addf %528, %527 : vector<2x32xf32>
    %530 = arith.divf %528, %529 : vector<2x32xf32>
    %531 = vector.extract_strided_slice %523 {offsets = [0, 32], sizes = [2, 32], strides = [1, 1]} : vector<2x128xf32> to vector<2x32xf32>
    %532 = arith.negf %531 : vector<2x32xf32>
    %533 = math.exp %532 : vector<2x32xf32>
    %cst_201 = arith.constant 1.000000e+00 : f32
    %534 = vector.broadcast %cst_201 : f32 to vector<2x32xf32>
    %535 = arith.addf %534, %533 : vector<2x32xf32>
    %536 = arith.divf %534, %535 : vector<2x32xf32>
    %537 = vector.extract_strided_slice %523 {offsets = [0, 64], sizes = [2, 32], strides = [1, 1]} : vector<2x128xf32> to vector<2x32xf32>
    %538 = math.tanh %537 : vector<2x32xf32>
    %539 = vector.extract_strided_slice %523 {offsets = [0, 96], sizes = [2, 32], strides = [1, 1]} : vector<2x128xf32> to vector<2x32xf32>
    %540 = arith.negf %539 : vector<2x32xf32>
    %541 = math.exp %540 : vector<2x32xf32>
    %cst_202 = arith.constant 1.000000e+00 : f32
    %542 = vector.broadcast %cst_202 : f32 to vector<2x32xf32>
    %543 = arith.addf %542, %541 : vector<2x32xf32>
    %544 = arith.divf %542, %543 : vector<2x32xf32>
    %545 = arith.mulf %536, %524 : vector<2x32xf32>
    %546 = arith.mulf %530, %538 : vector<2x32xf32>
    %547 = arith.addf %545, %546 : vector<2x32xf32>
    %548 = math.tanh %547 : vector<2x32xf32>
    %549 = arith.mulf %544, %548 : vector<2x32xf32>
    %550 = vector.extract_strided_slice %521 {offsets = [0, 128], sizes = [2, 128], strides = [1, 1]} : vector<2x256xf32> to vector<2x128xf32>
    %551 = vector.extract_strided_slice %522 {offsets = [0, 32], sizes = [2, 32], strides = [1, 1]} : vector<2x64xf32> to vector<2x32xf32>
    %552 = vector.extract_strided_slice %550 {offsets = [0, 0], sizes = [2, 32], strides = [1, 1]} : vector<2x128xf32> to vector<2x32xf32>
    %553 = arith.negf %552 : vector<2x32xf32>
    %554 = math.exp %553 : vector<2x32xf32>
    %cst_203 = arith.constant 1.000000e+00 : f32
    %555 = vector.broadcast %cst_203 : f32 to vector<2x32xf32>
    %556 = arith.addf %555, %554 : vector<2x32xf32>
    %557 = arith.divf %555, %556 : vector<2x32xf32>
    %558 = vector.extract_strided_slice %550 {offsets = [0, 32], sizes = [2, 32], strides = [1, 1]} : vector<2x128xf32> to vector<2x32xf32>
    %559 = arith.negf %558 : vector<2x32xf32>
    %560 = math.exp %559 : vector<2x32xf32>
    %cst_204 = arith.constant 1.000000e+00 : f32
    %561 = vector.broadcast %cst_204 : f32 to vector<2x32xf32>
    %562 = arith.addf %561, %560 : vector<2x32xf32>
    %563 = arith.divf %561, %562 : vector<2x32xf32>
    %564 = vector.extract_strided_slice %550 {offsets = [0, 64], sizes = [2, 32], strides = [1, 1]} : vector<2x128xf32> to vector<2x32xf32>
    %565 = math.tanh %564 : vector<2x32xf32>
    %566 = vector.extract_strided_slice %550 {offsets = [0, 96], sizes = [2, 32], strides = [1, 1]} : vector<2x128xf32> to vector<2x32xf32>
    %567 = arith.negf %566 : vector<2x32xf32>
    %568 = math.exp %567 : vector<2x32xf32>
    %cst_205 = arith.constant 1.000000e+00 : f32
    %569 = vector.broadcast %cst_205 : f32 to vector<2x32xf32>
    %570 = arith.addf %569, %568 : vector<2x32xf32>
    %571 = arith.divf %569, %570 : vector<2x32xf32>
    %572 = arith.mulf %563, %551 : vector<2x32xf32>
    %573 = arith.mulf %557, %565 : vector<2x32xf32>
    %574 = arith.addf %572, %573 : vector<2x32xf32>
    %575 = math.tanh %574 : vector<2x32xf32>
    %576 = arith.mulf %571, %575 : vector<2x32xf32>
    %577 = tpu.concatenate %549, %576 in 1 : vector<2x32xf32>, vector<2x32xf32> -> vector<2x64xf32>
    %c0_206 = arith.constant 0 : index
    %c0_207 = arith.constant 0 : index
    %578 = vector.load %arg6[%c0_206, %c0_207] : memref<2x64xf32, #tpu.memory_space<vmem>>, vector<2x64xf32>
    tpu.vector_store %arg6[%c0_206, %c0_207], %577 {strides = array<i32>} : memref<2x64xf32, #tpu.memory_space<vmem>>, vector<2x64xf32>,
    %579 = tpu.concatenate %547, %574 in 1 : vector<2x32xf32>, vector<2x32xf32> -> vector<2x64xf32>
    %c0_208 = arith.constant 0 : index
    %c0_209 = arith.constant 0 : index
    %580 = vector.load %arg7[%c0_208, %c0_209] : memref<2x64xf32, #tpu.memory_space<vmem>>, vector<2x64xf32>
    tpu.vector_store %arg7[%c0_208, %c0_209], %579 {strides = array<i32>} : memref<2x64xf32, #tpu.memory_space<vmem>>, vector<2x64xf32>,
    %c7_210 = arith.constant 7 : index
    %c0_211 = arith.constant 0 : index
    %c0_212 = arith.constant 0 : index
    %581 = vector.load %arg4[%c7_210, %c0_211, %c0_212] : memref<8x2x64xf32, #tpu.memory_space<vmem>>, vector<1x2x32xf32>
    %582 = vector.shape_cast %581 : vector<1x2x32xf32> to vector<2x32xf32>
    %583 = vector.shape_cast %549 : vector<2x32xf32> to vector<1x2x32xf32>
    tpu.vector_store %arg4[%c7_210, %c0_211, %c0_212], %583 {strides = array<i32>} : memref<8x2x64xf32, #tpu.memory_space<vmem>>, vector<1x2x32xf32>,
    %c0_213 = arith.constant 0 : index
    %c0_214 = arith.constant 0 : index
    %c32_215 = arith.constant 32 : index
    %584 = vector.load %arg4[%c0_213, %c0_214, %c32_215] : memref<8x2x64xf32, #tpu.memory_space<vmem>>, vector<1x2x32xf32>
    %585 = vector.shape_cast %584 : vector<1x2x32xf32> to vector<2x32xf32>
    %586 = vector.shape_cast %576 : vector<2x32xf32> to vector<1x2x32xf32>
    tpu.vector_store %arg4[%c0_213, %c0_214, %c32_215], %586 {strides = array<i32>} : memref<8x2x64xf32, #tpu.memory_space<vmem>>, vector<1x2x32xf32>,
    return
  }
}

</mosaic_0001>

<bundles_post_ra>
// kernel: tpu_custom_call.1
= control target key start
LH: loop header
LB: loop body
LE: loop exit
PB: predicated region body
PF: predicated region fallthrough
CT: control target
= control target key end

     0   :  { %9 = vsyncpa [#allocation6], 0  ;;  %s2323_s0 = inlined_call_operand.hbm [shape: f32[16,32], index: 0, kind: input, shape index: {}]   ;;  %s2324_s1 = inlined_call_operand.hbm [shape: f32[32,256], index: 1, kind: input, shape index: {}]   ;;  %s2325_s2 = inlined_call_operand.vmem [shape: f32[1,256], index: 2, kind: input, shape index: {}]   ;;  %s2326_s3 = inlined_call_operand.hbm [shape: f32[64,256], index: 3, kind: input, shape index: {}]   ;;  %s2327_s4 = inlined_call_operand.hbm [shape: f32[8,2,64], index: 4, kind: output, shape index: {}]  }
   0x1   :  { %10 = vsyncpa [#allocation9], 0 }
   0x2   :  { %11 = vsyncpa [#allocation7], 0  ;;  %s2006_s15 = smov [#allocation8]   ;;  %s1912_s19 = scalar_lea.hbm %s2324_s1, 1024 }
   0x3   :  { %s29_s16 = sshll.u32 %s2006_s15, 4  ;;  %p1913_p0 = scmp.ne.s32.totalorder %s2324_s1, %s1912_s19  ;;  %s30_s16 = int_to_ptr.vmem [resolvable:$true] %s29_s16 }
   0x4   :  { %p1916_p1 = scmp.lt.u32.totalorder %s1912_s19, %s2324_s1 }
   0x6   :  { %p1918_p2 = pnand %p1916_p1, %p1913_p0 }
   0x8   :  { %1921 = shalt.err (!%p1918_p2)
}
   0x9   :  { %s1922_s24 = scalar_lea.vmem %s30_s16, 1024  ;;  %p1927_p4 = scmp.lt.s32.totalorder %s30_s16, %s30_s16 }
   0xa   :  { %p1923_p3 = scmp.ne.s32.totalorder %s30_s16, %s1922_s24  ;;  %p1928_p5 = scmp.lt.s32.totalorder %s1922_s24, %s1922_s24 }
   0xc   :  { %p1929_p6 = por %p1928_p5, %p1927_p4 }
   0xe   :  { %p1930_p7 = pnand %p1929_p6, %p1923_p3 }
  0x10   :  { %1933 = shalt.err (!%p1930_p7)
}
  0x11   :  { %s2007_s25 = smov 256   ;;  %s2008_s26 = smov 16  }
  0x12   :  { %35 = dma.hbm_to_vmem [thread:$0]  %s2324_s1, 1024, %s30_s16, [#allocation9], %s2007_s25, %s2007_s25, %s2008_s26  }
  0x13   :  { %s2009_s29 = smov [#allocation5]   ;;  %s1934_s7 = scalar_lea.hbm %s2323_s0, 256 }
  0x14   :  { %s17_s30 = sshll.u32 %s2009_s29, 4  ;;  %p1935_p8 = scmp.ne.s32.totalorder %s2323_s0, %s1934_s7  ;;  %s18_s30 = int_to_ptr.vmem [resolvable:$true] %s17_s30 }
  0x15   :  { %p1938_p9 = scmp.lt.u32.totalorder %s1934_s7, %s2323_s0 }
  0x17   :  { %p1940_p10 = pnand %p1938_p9, %p1935_p8 }
  0x19   :  { %1943 = shalt.err (!%p1940_p10)
}
  0x1a   :  { %s1944_s12 = scalar_lea.vmem %s18_s30, 256  ;;  %p1949_p12 = scmp.lt.s32.totalorder %s18_s30, %s18_s30 }
  0x1b   :  { %p1945_p11 = scmp.ne.s32.totalorder %s18_s30, %s1944_s12  ;;  %p1950_p13 = scmp.lt.s32.totalorder %s1944_s12, %s1944_s12 }
  0x1d   :  { %p1951_p0 = por %p1950_p13, %p1949_p12 }
  0x1f   :  { %p1952_p1 = pnand %p1951_p0, %p1945_p11 }
  0x21   :  { %1955 = shalt.err (!%p1952_p1)
}
  0x22   :  { %s2010_s1 = smov 128   ;;  %s2011_s13 = smov 8  }
  0x23   :  { %23 = dma.hbm_to_vmem [thread:$0]  %s2323_s0, 256, %s18_s30, [#allocation6], %s2010_s1, %s2010_s1, %s2011_s13  }
  0x24   :  { %s2012_s16 = smov [#allocation10]   ;;  %s1956_s20 = scalar_lea.hbm %s2326_s3, 2048 }
  0x25   :  { %s43_s17 = sshll.u32 %s2012_s16, 4  ;;  %p1957_p2 = scmp.ne.s32.totalorder %s2326_s3, %s1956_s20  ;;  %s44_s17 = int_to_ptr.vmem [resolvable:$true] %s43_s17 }
  0x26   :  { %p1960_p3 = scmp.lt.u32.totalorder %s1956_s20, %s2326_s3 }
  0x28   :  { %p1962_p4 = pnand %p1960_p3, %p1957_p2 }
  0x2a   :  { %1965 = shalt.err (!%p1962_p4)
}
  0x2b   :  { %s1966_s27 = scalar_lea.vmem %s44_s17, 2048  ;;  %p1971_p6 = scmp.lt.s32.totalorder %s44_s17, %s44_s17 }
  0x2c   :  { %p1967_p5 = scmp.ne.s32.totalorder %s44_s17, %s1966_s27  ;;  %p1972_p7 = scmp.lt.s32.totalorder %s1966_s27, %s1966_s27 }
  0x2e   :  { %p1973_p8 = por %p1972_p7, %p1971_p6 }
  0x30   :  { %p1974_p9 = pnand %p1973_p8, %p1967_p5 }
  0x32   :  { %1977 = shalt.err (!%p1974_p9)
}
  0x33   :  { %49 = dma.hbm_to_vmem [thread:$0]  %s2326_s3, 2048, %s44_s17, [#allocation9], %s2007_s25, %s2007_s25, %s2008_s26  }
  0x34   :  { %2000 = dma.done.wait [#allocation6], 256  }
  0x35   :  { %2001 = vsyncadd [#allocation6], 4294967040 }
  0x36   :  { %2002 = dma.done.wait [#allocation9], 3072  }
  0x37   :  { %2003 = vsyncadd [#allocation9], 4294964224  ;;  %vm169_vm0 = vcmask 517120   ;;  %v2013_v0 = vmov 0.0   ;;  %v62_v1 = vld [vmem:[#allocation8 + $0x8] sm:$0xff]  ;;  %v64_v2 = vld [vmem:[#allocation8 + $0x18] sm:$0xff]  ;;  %v71_v41 = vlaneseq }
  0x38   :  { %152 = vmatprep.mubr.f32.mxu0 %v2013_v0  ;;  %257 = vmatprep.mubr.f32.mxu1 %v2013_v0  ;;  %170 = vst.msk [vmem:[#allocation3] sm:$0x3] %vm169_vm0, %v2013_v0  ;;  %171 = vst.msk [vmem:[#allocation4] sm:$0x3] %vm169_vm0, %v2013_v0  ;;  %v61_v3 = vld [vmem:[#allocation8] sm:$0xff]  ;;  %v1635_v4 = vpack.c.bf16 %v64_v2, %v62_v1  ;;  %v63_v5 = vld [vmem:[#allocation8 + $0x10] sm:$0xff] }
  0x39   :  { %v174_v6 = vld [vmem:[#allocation10 + $0x8] sm:$0xff]  ;;  %v176_v7 = vld [vmem:[#allocation10 + $0x18] sm:$0xff]  ;;  %v1637_v8 = vpack.c.bf16 %v63_v5, %v61_v3  ;;  %v173_v10 = vld [vmem:[#allocation10] sm:$0xff]  ;;  %vm81_vm1 = vcmask 261120   ;;  %s2014_s3 = smov 32   ;;  %vm189_vm2 = vcmask 523264  }
  0x3a   :  { %v2092_v9 = vpack.c.bf16 %v176_v7, %v174_v6  ;;  %v175_v11 = vld [vmem:[#allocation10 + $0x10] sm:$0xff]  ;;  %v66_v12 = vld [vmem:[#allocation8 + $0x28] sm:$0xff]  ;;  %1636 = vmatprep.subr.bf16.mxu0 %v1635_v4  ;;  %v68_v14 = vld [vmem:[#allocation8 + $0x38] sm:$0xff]  ;;  %v72_v42 = vshrl.u32 %v71_v41, 7  ;;  %s2016_s29 = smov 96   ;;  %vm340_vm3 = vcmask 254976  }
  0x3b   :  { %v2094_v13 = vpack.c.bf16 %v175_v11, %v173_v10  ;;  %v65_v15 = vld [vmem:[#allocation8 + $0x20] sm:$0xff]  ;;  %v67_v16 = vld [vmem:[#allocation8 + $0x30] sm:$0xff]  ;;  %1638 = vmatpush1.bf16.msra.mxu0 %v1637_v8  ;;  %v1639_v17 = vpack.c.bf16 %v68_v14, %v66_v12  ;;  %v178_v19 = vld [vmem:[#allocation10 + $0x28] sm:$0xff]  ;;  %vm343_vm4 = vcmask 517376   ;;  %vm522_vm5 = vcmask 257026   ;;  %s2017_s30 = smov [#allocation11]  }
  0x3c   :  { %1644 = vmatprep.subr.bf16.mxu1 %v2092_v9  ;;  %v1641_v18 = vpack.c.bf16 %v67_v16, %v65_v15  ;;  %v180_v20 = vld [vmem:[#allocation10 + $0x38] sm:$0xff]  ;;  %v177_v21 = vld [vmem:[#allocation10 + $0x20] sm:$0xff]  ;;  %v179_v23 = vld [vmem:[#allocation10 + $0x30] sm:$0xff]  ;;  %v73_v43 = vsub.s32 0, %v72_v42  ;;  %v77_v45 = vsub.s32 1, %v72_v42  ;;  %vm525_vm6 = vcmask 519426  }
  0x3d   :  { %1646 = vmatpush1.bf16.msra.mxu1 %v2094_v13  ;;  %v2098_v22 = vpack.c.bf16 %v180_v20, %v178_v19  ;;  %v182_v24 = vld [vmem:[#allocation10 + $0x48] sm:$0xff]  ;;  %1640 = vmatprep.subr.bf16.mxu0 %v1639_v17  ;;  %v2100_v25 = vpack.c.bf16 %v179_v23, %v177_v21  ;;  %v184_v26 = vld [vmem:[#allocation10 + $0x58] sm:$0xff]  ;;  %v181_v27 = vld [vmem:[#allocation10 + $0x40] sm:$0xff]  ;;  %vm513_vm7 = vcmask 519170   ;;  %vm704_vm8 = vcmask 259076   ;;  %s1596_s5 = sshll.u32 %s2017_s30, 4  ;;  %s1597_s5 = int_to_ptr.vmem [resolvable:$true] %s1596_s5 }
  0x3e   :  { %v183_v28 = vld [vmem:[#allocation10 + $0x50] sm:$0xff]  ;;  %v2103_v29 = vpack.c.bf16 %v184_v26, %v182_v24  ;;  %v186_v30 = vld [vmem:[#allocation10 + $0x68] sm:$0xff]  ;;  %v188_v31 = vld [vmem:[#allocation10 + $0x78] sm:$0xff]  ;;  %vm707_vm9 = vcmask 521476   ;;  %vm695_vm10 = vcmask 521220   ;;  %vm886_vm11 = vcmask 261126   ;;  %p1983_p11 = scmp.lt.s32.totalorder %s1597_s5, %s1597_s5 }
  0x3f   :  { %1648 = vmatprep.subr.bf16.mxu1 %v2098_v22  ;;  %1642 = vmatpush1.bf16.msra.mxu0 %v1641_v18  ;;  %v59_v32 = vld [vmem:[#allocation5] sm:$0xff]  ;;  %v2106_v33 = vpack.c.bf16 %v183_v28, %v181_v27  ;;  %v2108_v34 = vld [vmem:[#allocation4] sm:$0x3]  ;;  %v2112_v35 = vpack.c.bf16 %v188_v31, %v186_v30  ;;  %v185_v36 = vld [vmem:[#allocation10 + $0x60] sm:$0xff]  ;;  %vm889_vm12 = vcmask 523526   ;;  %vm877_vm13 = vcmask 523270  }
  0x40   :  { %1660 = vmatprep.subr.bf16.mxu0 %v2092_v9  ;;  %v187_v37 = vld [vmem:[#allocation10 + $0x70] sm:$0xff]  ;;  %280 = vrot.lane.b32.xlu1 %v2108_v34, %s2014_s3  ;;  %v60_v38 = vld [vmem:[#allocation5 + $0x8] sm:$0xff]  ;;  %v172_v40 = vld [vmem:[#allocation3] sm:$0x3]  ;;  %s1978_s6 = scalar_lea.vmem %s1597_s5, 256 }
  0x41   :  { %1650 = vmatpush1.bf16.msra.mxu1 %v2100_v25  ;;  %v2120_v39 = vpack.c.bf16 %v187_v37, %v185_v36  ;;  %v69_v44 = vld [vmem:[%s2325_s2] sm:$0x3]  ;;  %s2015_s2 = smov 64   ;;  %p1979_p10 = scmp.ne.s32.totalorder %s1597_s5, %s1978_s6 }
  0x42   :  { %1652 = vmatprep.subr.bf16.mxu1 %v2103_v29  ;;  %1609 = vmatmul.mubr.msk.f32.vlgmr.msra.gmra.mrb[0].mxu0 %vm81_vm1, %v59_v32  ;;  %v74_v46 = vrot.slane %v69_v44, %v73_v43  ;;  %v78_v47 = vrot.slane %v69_v44, %v77_v45  ;;  %p1984_p12 = scmp.lt.s32.totalorder %s1978_s6, %s1978_s6 }
  0x43   :  { %158 = vmatprep.mubr.f32.mxu0 %v2013_v0  ;;  %1662 = vmatpush1.bf16.msra.mxu0 %v2094_v13 }
  0x44   :  { %1664 = vmatprep.subr.bf16.mxu0 %v2098_v22  ;;  %p1985_p13 = por %p1984_p12, %p1983_p11 }
  0x45   :  { %1654 = vmatpush1.bf16.msra.mxu1 %v2106_v33 }
  0x46   :  { %1656 = vmatprep.subr.bf16.mxu1 %v2112_v35  ;;  %1610 = vmatmul.mubr.msk.f32.gmra.mrb[2].mxu0 %vm81_vm1, %v60_v38  ;;  %p1986_p0 = pnand %p1985_p13, %p1979_p10 }
  0x47   :  { %1666 = vmatpush1.bf16.msra.mxu0 %v2100_v25  ;;  %429 = vmatprep.mubr.f32.mxu0 %v2013_v0 }
  0x48   :  { %1668 = vmatprep.subr.bf16.mxu0 %v2103_v29 }
  0x49   :  { %1658 = vmatpush1.bf16.msra.mxu1 %v2120_v39 }
  0x4a   :  { %1676 = vmatprep.subr.bf16.mxu1 %v2092_v9 }
  0x4b   :  { %1670 = vmatpush1.bf16.msra.mxu0 %v2106_v33 }
  0x4c   :  { %1611 = vmatmul.mubr.msk.f32.vlgmr.msra.gmra.mrb[0].mxu1 %vm189_vm2, %v172_v40  ;;  %1672 = vmatprep.subr.bf16.mxu0 %v2112_v35 }
  0x4d   :  { %1678 = vmatpush1.bf16.msra.mxu1 %v2094_v13  ;;  %611 = vmatprep.mubr.f32.mxu1 %v2013_v0 }
  0x4e   :  { %1680 = vmatprep.subr.bf16.mxu1 %v2098_v22 }
  0x4f   :  { %1674 = vmatpush1.bf16.msra.mxu0 %v2120_v39 }
  0x50   :  { %1692 = vmatprep.subr.bf16.mxu0 %v2092_v9 }
  0x51   :  { %1682 = vmatpush1.bf16.msra.mxu1 %v2100_v25 }
  0x52   :  { %1684 = vmatprep.subr.bf16.mxu1 %v2103_v29 }
  0x55   :  { %1686 = vmatpush1.bf16.msra.mxu1 %v2106_v33 }
  0x56   :  { %1688 = vmatprep.subr.bf16.mxu1 %v2112_v35 }
  0x59   :  { %1690 = vmatpush1.bf16.msra.mxu1 %v2120_v39 }
  0x5a   :  { %1708 = vmatprep.subr.bf16.mxu1 %v2092_v9 }
  0xb2   :  { %v281_v16 = vpop.permute.xlu1 %280 }
 0x115   :  { %v154_v48 = vpop.f32.mrb[0].mxu0 }
 0x116   :  { %v155_v49 = vadd.f32 %v154_v48, %v74_v46  ;;  %v156_v50 = vpop.f32.mrb[1].mxu0 }
 0x117   :  { %v157_v51 = vadd.f32 %v156_v50, %v78_v47 }
 0x118   :  { %165 = vst [vmem:[#allocation2] sm:$0xff] %v155_v49 }
 0x119   :  { %166 = vst [vmem:[#allocation2 + $0x8] sm:$0xff] %v157_v51  ;;  %v160_v52 = vpop.f32.mrb[2].mxu0 }
 0x11a   :  { %v161_v53 = vadd.f32 %v160_v52, %v74_v46  ;;  %v162_v54 = vpop.f32.mrb[3].mxu0 }
 0x11b   :  { %v163_v55 = vadd.f32 %v162_v54, %v78_v47 }
 0x11c   :  { %167 = vst [vmem:[#allocation2 + $0x10] sm:$0xff] %v161_v53 }
 0x11d   :  { %168 = vst [vmem:[#allocation2 + $0x18] sm:$0xff] %v163_v55 }
 0x11f   :  { %v259_v56 = vpop.f32.mrb[0].mxu1  ;;  %v264_v57 = vld [vmem:[#allocation2] sm:$0x3]  ;;  %v436_v45 = vld [vmem:[#allocation2] sm:$0xc] }
 0x120   :  { %v261_v58 = vpop.f32.mrb[1].mxu1  ;;  %v269_v59 = vadd.f32 %v264_v57, %v259_v56 }
 0x122   :  { %1784 = vtanh.f32 %v269_v59  ;;  %v1612_v2 = vmul.f32 -1.442695, %v269_v59 }
 0x124   :  { %v265_v60 = vld [vmem:[#allocation2 + $0x18] sm:$0xc0]  ;;  %v437_v41 = vld [vmem:[#allocation2 + $0x18] sm:$0x30] }
 0x125   :  { %v267_v61 = vrot.slane %v265_v60, 6  ;;  %v439_v46 = vrot.slane %v437_v41, 2 }
 0x127   :  { %v270_v62 = vadd.f32 %v267_v61, %v261_v58 }
 0x129   :  { %1786 = vtanh.f32 %v270_v62  ;;  %v1613_v3 = vmul.f32 -1.442695, %v270_v62 }
 0x12a   :  { %1788 = vpow2.f32 %v1612_v2 }
 0x12b   :  { %1790 = vpow2.f32 %v1613_v3 }
 0x12c   :  { %v1785_v63 = vpop.eup %1784 }
 0x12d   :  { %285 = vrot.lane.b32.xlu0 %v1785_v63, %s2015_s2 }
 0x133   :  { %v1787_v1 = vpop.eup %1786 }
 0x134   :  { %309 = vrot.lane.b32.xlu0 %v1787_v1, %s2015_s2  ;;  %v1789_v4 = vpop.eup %1788 }
 0x135   :  { %v275_v5 = vadd.f32 1.0, %v1789_v4  ;;  %v1791_v6 = vpop.eup %1790 }
 0x136   :  { %v303_v7 = vadd.f32 1.0, %v1791_v6 }
 0x137   :  { %1792 = vrcp.f32 %v275_v5 }
 0x138   :  { %1794 = vrcp.f32 %v303_v7 }
 0x141   :  { %v1793_v8 = vpop.eup %1792 }
 0x142   :  { %v1795_v12 = vpop.eup %1794  ;;  %v283_v17 = vmul.f32 %v1793_v8, %v281_v16 }
 0x143   :  { %v307_v20 = vmul.f32 %v1795_v12, %v2108_v34 }
 0x19f   :  { %v286_v10 = vpop.permute.xlu0 %285 }
 0x1a0   :  { %v288_v11 = vmul.f32 %v1793_v8, %v286_v10 }
 0x1a2   :  { %290 = vrot.lane.b32.xlu1 %v288_v11, %s2014_s3 }
 0x1a6   :  { %v310_v14 = vpop.permute.xlu0 %309 }
 0x1a7   :  { %v312_v15 = vmul.f32 %v1795_v12, %v310_v14 }
 0x1a9   :  { %314 = vrot.lane.b32.xlu0 %v312_v15, %s2014_s3 }
 0x214   :  { %v291_v18 = vpop.permute.xlu1 %290 }
 0x215   :  { %v293_v19 = vadd.f32 %v291_v18, %v283_v17 }
 0x217   :  { %1796 = vtanh.f32 %v293_v19 }
 0x21b   :  { %v315_v21 = vpop.permute.xlu0 %314 }
 0x21c   :  { %v317_v23 = vadd.f32 %v315_v21, %v307_v20 }
 0x21e   :  { %1798 = vtanh.f32 %v317_v23 }
 0x221   :  { %v1797_v24 = vpop.eup %1796 }
 0x222   :  { %296 = vrot.lane.b32.xlu1 %v1797_v24, %s2015_s2  ;;  %v619_v24 = vld [vmem:[#allocation2 + $0x18] sm:$0xc] }
 0x228   :  { %v1799_v26 = vpop.eup %1798 }
 0x229   :  { %320 = vrot.lane.b32.xlu0 %v1799_v26, %s2015_s2 }
 0x294   :  { %v297_v27 = vpop.permute.xlu1 %296 }
 0x295   :  { %v299_v28 = vmul.f32 %v1793_v8, %v297_v27 }
 0x297   :  { %325 = vrot.lane.b32.xlu1 %v299_v28, %s2014_s3 }
 0x29b   :  { %v321_v30 = vpop.permute.xlu0 %320  ;;  %335 = vrot.lane.b32.xlu1 %v293_v19, %s2016_s29 }
 0x29c   :  { %v323_v31 = vmul.f32 %v1795_v12, %v321_v30  ;;  %v618_v30 = vld [vmem:[#allocation2] sm:$0x30] }
 0x29e   :  { %329 = vrot.lane.b32.xlu0 %v323_v31, %s2015_s2  ;;  %v621_v31 = vrot.slane %v619_v24, 6 }
 0x309   :  { %v326_v32 = vpop.permute.xlu1 %325 }
 0x30a   :  { %341 = vst.msk [vmem:[#allocation11] sm:$0x3] %vm340_vm3, %v326_v32 }
 0x30d   :  { %v336_v34 = vpop.permute.xlu1 %335 }
 0x30e   :  { %v338_v36 = vsel %vm81_vm1, %v336_v34, %v317_v23 }
 0x30f   :  { %339 = vst.msk [vmem:[#allocation4] sm:$0x3] %vm169_vm0, %v338_v36 }
 0x310   :  { %v330_v37 = vpop.permute.xlu0 %329 }
 0x311   :  { %v332_v38 = vsel %vm81_vm1, %v326_v32, %v330_v37  ;;  %344 = vst.msk [vmem:[#allocation11 + $0xe] sm:$0x3] %vm343_vm4, %v330_v37 }
 0x312   :  { %333 = vst.msk [vmem:[#allocation3] sm:$0x3] %vm169_vm0, %v332_v38 }
 0x316   :  { %v449_v51 = vld [vmem:[#allocation4] sm:$0x3] }
 0x317   :  { %v458_v53 = vrot.slane %v449_v51, 6 }
 0x319   :  { %v345_v40 = vld [vmem:[#allocation3] sm:$0x3] }
 0x31a   :  { %1614 = vmatmul.mubr.msk.f32.vlgmr.msra.gmra.mrb[4].mxu0 %vm189_vm2, %v345_v40 }
 0x31b   :  { %1694 = vmatpush1.bf16.msra.mxu0 %v2094_v13  ;;  %793 = vmatprep.mubr.f32.mxu0 %v2013_v0 }
 0x31c   :  { %1696 = vmatprep.subr.bf16.mxu0 %v2098_v22 }
 0x31f   :  { %1698 = vmatpush1.bf16.msra.mxu0 %v2100_v25 }
 0x320   :  { %1700 = vmatprep.subr.bf16.mxu0 %v2103_v29 }
 0x323   :  { %1702 = vmatpush1.bf16.msra.mxu0 %v2106_v33 }
 0x324   :  { %1704 = vmatprep.subr.bf16.mxu0 %v2112_v35 }
 0x327   :  { %1706 = vmatpush1.bf16.msra.mxu0 %v2120_v39 }
 0x328   :  { %1724 = vmatprep.subr.bf16.mxu0 %v2092_v9 }
 0x3ed   :  { %v431_v42 = vpop.f32.mrb[4].mxu0 }
 0x3ee   :  { %v443_v43 = vrot.slane %v431_v42, 6  ;;  %v433_v44 = vpop.f32.mrb[5].mxu0 }
 0x3ef   :  { %v444_v47 = vrot.slane %v433_v44, 6 }
 0x3f0   :  { %v447_v48 = vadd.f32 %v443_v43, %v436_v45 }
 0x3f1   :  { %v448_v49 = vadd.f32 %v444_v47, %v439_v46 }
 0x3f2   :  { %1800 = vtanh.f32 %v447_v48  ;;  %v1615_v9 = vmul.f32 -1.442695, %v447_v48 }
 0x3f3   :  { %1802 = vtanh.f32 %v448_v49  ;;  %v1616_v54 = vmul.f32 -1.442695, %v448_v49 }
 0x3f4   :  { %1804 = vpow2.f32 %v1615_v9 }
 0x3f5   :  { %1806 = vpow2.f32 %v1616_v54 }
 0x3fc   :  { %v1801_v50 = vpop.eup %1800 }
 0x3fd   :  { %v1803_v52 = vpop.eup %1802  ;;  %464 = vrot.lane.b32.xlu0 %v1801_v50, %s2015_s2 }
 0x3fe   :  { %489 = vrot.lane.b32.xlu1 %v1803_v52, %s2015_s2  ;;  %v1805_v55 = vpop.eup %1804 }
 0x3ff   :  { %v1807_v56 = vpop.eup %1806  ;;  %v453_v57 = vadd.f32 1.0, %v1805_v55 }
 0x400   :  { %v482_v58 = vadd.f32 1.0, %v1807_v56 }
 0x401   :  { %459 = vrot.lane.b32.xlu0 %v458_v53, %s2014_s3  ;;  %1808 = vrcp.f32 %v453_v57 }
 0x402   :  { %1810 = vrcp.f32 %v482_v58 }
 0x40b   :  { %v1809_v59 = vpop.eup %1808 }
 0x40c   :  { %v1811_v61 = vpop.eup %1810 }
 0x40d   :  { %v487_v5 = vmul.f32 %v1811_v61, %v458_v53 }
 0x46f   :  { %v465_v60 = vpop.permute.xlu0 %464 }
 0x470   :  { %v467_v62 = vmul.f32 %v1809_v59, %v465_v60  ;;  %v490_v63 = vpop.permute.xlu1 %489 }
 0x471   :  { %v492_v1 = vmul.f32 %v1811_v61, %v490_v63 }
 0x472   :  { %469 = vrot.lane.b32.xlu1 %v467_v62, %s2014_s3 }
 0x473   :  { %494 = vrot.lane.b32.xlu0 %v492_v1, %s2014_s3  ;;  %v460_v2 = vpop.permute.xlu0 %459 }
 0x474   :  { %v462_v3 = vmul.f32 %v1809_v59, %v460_v2 }
 0x4e4   :  { %v470_v4 = vpop.permute.xlu1 %469 }
 0x4e5   :  { %v472_v6 = vadd.f32 %v470_v4, %v462_v3  ;;  %v495_v7 = vpop.permute.xlu0 %494 }
 0x4e6   :  { %v497_v8 = vadd.f32 %v495_v7, %v487_v5 }
 0x4e7   :  { %1812 = vtanh.f32 %v472_v6 }
 0x4e8   :  { %1814 = vtanh.f32 %v497_v8 }
 0x4f1   :  { %v1813_v10 = vpop.eup %1812 }
 0x4f2   :  { %v1815_v11 = vpop.eup %1814  ;;  %475 = vrot.lane.b32.xlu1 %v1813_v10, %s2015_s2  ;;  %v801_v10 = vld [vmem:[#allocation2 + $0x18] sm:$0x3] }
 0x4f3   :  { %500 = vrot.lane.b32.xlu0 %v1815_v11, %s2015_s2 }
 0x564   :  { %v476_v12 = vpop.permute.xlu1 %475 }
 0x565   :  { %v478_v14 = vmul.f32 %v1809_v59, %v476_v12  ;;  %v501_v15 = vpop.permute.xlu0 %500 }
 0x566   :  { %v503_v16 = vmul.f32 %v1811_v61, %v501_v15  ;;  %v800_v15 = vld [vmem:[#allocation2] sm:$0xc0] }
 0x567   :  { %505 = vrot.lane.b32.xlu1 %v478_v14, %s2014_s3 }
 0x568   :  { %509 = vrot.lane.b32.xlu0 %v503_v16, %s2015_s2 }
 0x56b   :  { %516 = vrot.lane.b32.xlu1 %v472_v6, %s2016_s29 }
 0x5d9   :  { %v506_v17 = vpop.permute.xlu1 %505 }
 0x5da   :  { %523 = vst.msk [vmem:[#allocation11] sm:$0xc] %vm522_vm5, %v506_v17  ;;  %v510_v18 = vpop.permute.xlu0 %509 }
 0x5db   :  { %v512_v19 = vsel %vm81_vm1, %v506_v17, %v510_v18  ;;  %526 = vst.msk [vmem:[#allocation11 + $0xa] sm:$0xc] %vm525_vm6, %v510_v18 }
 0x5dc   :  { %514 = vst.msk [vmem:[#allocation3 - $0x2] sm:$0xc] %vm513_vm7, %v512_v19 }
 0x5dd   :  { %v517_v20 = vpop.permute.xlu1 %516 }
 0x5de   :  { %v519_v21 = vsel %vm81_vm1, %v517_v20, %v497_v8 }
 0x5df   :  { %520 = vst.msk [vmem:[#allocation4 - $0x2] sm:$0xc] %vm513_vm7, %v519_v21 }
 0x5e3   :  { %v527_v23 = vld [vmem:[#allocation3] sm:$0x3] }
 0x5e4   :  { %1617 = vmatmul.mubr.msk.f32.vlgmr.msra.gmra.mrb[2].mxu1 %vm189_vm2, %v527_v23 }
 0x5e5   :  { %1710 = vmatpush1.bf16.msra.mxu1 %v2094_v13  ;;  %975 = vmatprep.mubr.f32.mxu1 %v2013_v0 }
 0x5e6   :  { %1712 = vmatprep.subr.bf16.mxu1 %v2098_v22  ;;  %v631_v38 = vld [vmem:[#allocation4] sm:$0x3] }
 0x5e7   :  { %v640_v41 = vrot.slane %v631_v38, 4 }
 0x5e9   :  { %1714 = vmatpush1.bf16.msra.mxu1 %v2100_v25 }
 0x5ea   :  { %1716 = vmatprep.subr.bf16.mxu1 %v2103_v29 }
 0x5ed   :  { %1718 = vmatpush1.bf16.msra.mxu1 %v2106_v33 }
 0x5ee   :  { %1720 = vmatprep.subr.bf16.mxu1 %v2112_v35 }
 0x5f1   :  { %1722 = vmatpush1.bf16.msra.mxu1 %v2120_v39 }
 0x6b7   :  { %v613_v26 = vpop.f32.mrb[2].mxu1 }
 0x6b8   :  { %v625_v27 = vrot.slane %v613_v26, 4  ;;  %v615_v28 = vpop.f32.mrb[3].mxu1 }
 0x6b9   :  { %v626_v32 = vrot.slane %v615_v28, 4 }
 0x6ba   :  { %v629_v34 = vadd.f32 %v625_v27, %v618_v30 }
 0x6bb   :  { %v630_v36 = vadd.f32 %v626_v32, %v621_v31 }
 0x6bc   :  { %1816 = vtanh.f32 %v629_v34  ;;  %v1618_v42 = vmul.f32 -1.442695, %v629_v34 }
 0x6bd   :  { %1818 = vtanh.f32 %v630_v36  ;;  %v1619_v43 = vmul.f32 -1.442695, %v630_v36 }
 0x6be   :  { %1820 = vpow2.f32 %v1618_v42 }
 0x6bf   :  { %1822 = vpow2.f32 %v1619_v43 }
 0x6c6   :  { %v1817_v37 = vpop.eup %1816 }
 0x6c7   :  { %v1819_v40 = vpop.eup %1818  ;;  %646 = vrot.lane.b32.xlu0 %v1817_v37, %s2015_s2 }
 0x6c8   :  { %671 = vrot.lane.b32.xlu1 %v1819_v40, %s2015_s2  ;;  %v1821_v44 = vpop.eup %1820 }
 0x6c9   :  { %v1823_v45 = vpop.eup %1822  ;;  %v635_v46 = vadd.f32 1.0, %v1821_v44 }
 0x6ca   :  { %v664_v47 = vadd.f32 1.0, %v1823_v45 }
 0x6cb   :  { %641 = vrot.lane.b32.xlu0 %v640_v41, %s2014_s3  ;;  %1824 = vrcp.f32 %v635_v46 }
 0x6cc   :  { %1826 = vrcp.f32 %v664_v47 }
 0x6d5   :  { %v1825_v48 = vpop.eup %1824 }
 0x6d6   :  { %v1827_v50 = vpop.eup %1826 }
 0x6d7   :  { %v669_v56 = vmul.f32 %v1827_v50, %v640_v41 }
 0x739   :  { %v647_v49 = vpop.permute.xlu0 %646 }
 0x73a   :  { %v649_v51 = vmul.f32 %v1825_v48, %v647_v49  ;;  %v672_v52 = vpop.permute.xlu1 %671 }
 0x73b   :  { %v674_v53 = vmul.f32 %v1827_v50, %v672_v52 }
 0x73c   :  { %651 = vrot.lane.b32.xlu1 %v649_v51, %s2014_s3 }
 0x73d   :  { %676 = vrot.lane.b32.xlu0 %v674_v53, %s2014_s3  ;;  %v642_v9 = vpop.permute.xlu0 %641 }
 0x73e   :  { %v644_v54 = vmul.f32 %v1825_v48, %v642_v9  ;;  %v983_v9 = vld [vmem:[#allocation2 + $0x8] sm:$0xc0] }
 0x7ae   :  { %v652_v55 = vpop.permute.xlu1 %651 }
 0x7af   :  { %v654_v57 = vadd.f32 %v652_v55, %v644_v54  ;;  %v677_v58 = vpop.permute.xlu0 %676  ;;  %v982_v55 = vld [vmem:[#allocation2 + $0x10] sm:$0x3] }
 0x7b0   :  { %v679_v59 = vadd.f32 %v677_v58, %v669_v56  ;;  %v985_v56 = vrot.slane %v983_v9, 6 }
 0x7b1   :  { %1828 = vtanh.f32 %v654_v57 }
 0x7b2   :  { %1830 = vtanh.f32 %v679_v59 }
 0x7bb   :  { %v1829_v60 = vpop.eup %1828 }
 0x7bc   :  { %v1831_v61 = vpop.eup %1830  ;;  %657 = vrot.lane.b32.xlu1 %v1829_v60, %s2015_s2 }
 0x7bd   :  { %682 = vrot.lane.b32.xlu0 %v1831_v61, %s2015_s2 }
 0x82e   :  { %v658_v62 = vpop.permute.xlu1 %657 }
 0x82f   :  { %v660_v63 = vmul.f32 %v1825_v48, %v658_v62  ;;  %v683_v1 = vpop.permute.xlu0 %682 }
 0x830   :  { %v685_v2 = vmul.f32 %v1827_v50, %v683_v1 }
 0x831   :  { %687 = vrot.lane.b32.xlu1 %v660_v63, %s2014_s3 }
 0x832   :  { %691 = vrot.lane.b32.xlu0 %v685_v2, %s2015_s2 }
 0x835   :  { %698 = vrot.lane.b32.xlu1 %v654_v57, %s2016_s29 }
 0x8a3   :  { %v688_v3 = vpop.permute.xlu1 %687 }
 0x8a4   :  { %705 = vst.msk [vmem:[#allocation11] sm:$0x30] %vm704_vm8, %v688_v3  ;;  %v692_v4 = vpop.permute.xlu0 %691 }
 0x8a5   :  { %v694_v5 = vsel %vm81_vm1, %v688_v3, %v692_v4  ;;  %708 = vst.msk [vmem:[#allocation11 + $0x6] sm:$0x30] %vm707_vm9, %v692_v4 }
 0x8a6   :  { %696 = vst.msk [vmem:[#allocation3 - $0x4] sm:$0x30] %vm695_vm10, %v694_v5 }
 0x8a7   :  { %v699_v6 = vpop.permute.xlu1 %698 }
 0x8a8   :  { %v701_v7 = vsel %vm81_vm1, %v699_v6, %v679_v59 }
 0x8a9   :  { %702 = vst.msk [vmem:[#allocation4 - $0x4] sm:$0x30] %vm695_vm10, %v701_v7 }
 0x8ad   :  { %v709_v8 = vld [vmem:[#allocation3] sm:$0x3] }
 0x8ae   :  { %1620 = vmatmul.mubr.msk.f32.vlgmr.msra.gmra.mrb[6].mxu0 %vm189_vm2, %v709_v8 }
 0x8af   :  { %1726 = vmatpush1.bf16.msra.mxu0 %v2094_v13  ;;  %1144 = vmatprep.mubr.f32.mxu0 %v2013_v0  ;;  %v803_v13 = vrot.slane %v801_v10, 2 }
 0x8b0   :  { %1728 = vmatprep.subr.bf16.mxu0 %v2098_v22 }
 0x8b3   :  { %1730 = vmatpush1.bf16.msra.mxu0 %v2100_v25  ;;  %v813_v25 = vld [vmem:[#allocation4] sm:$0x3] }
 0x8b4   :  { %1732 = vmatprep.subr.bf16.mxu0 %v2103_v29 }
 0x8b7   :  { %1734 = vmatpush1.bf16.msra.mxu0 %v2106_v33  ;;  %v822_v33 = vrot.slane %v813_v25, 2 }
 0x8b8   :  { %1736 = vmatprep.subr.bf16.mxu0 %v2112_v35 }
 0x8bb   :  { %1738 = vmatpush1.bf16.msra.mxu0 %v2120_v39 }
 0x981   :  { %v795_v11 = vpop.f32.mrb[6].mxu0 }
 0x982   :  { %v807_v12 = vrot.slane %v795_v11, 2  ;;  %v797_v14 = vpop.f32.mrb[7].mxu0 }
 0x983   :  { %v808_v16 = vrot.slane %v797_v14, 2 }
 0x984   :  { %v811_v17 = vadd.f32 %v807_v12, %v800_v15 }
 0x985   :  { %v812_v18 = vadd.f32 %v808_v16, %v803_v13 }
 0x986   :  { %1832 = vtanh.f32 %v811_v17  ;;  %v1621_v35 = vmul.f32 -1.442695, %v811_v17 }
 0x987   :  { %1834 = vtanh.f32 %v812_v18  ;;  %v1622_v39 = vmul.f32 -1.442695, %v812_v18 }
 0x988   :  { %1836 = vpow2.f32 %v1621_v35 }
 0x989   :  { %1838 = vpow2.f32 %v1622_v39 }
 0x990   :  { %v1833_v22 = vpop.eup %1832 }
 0x991   :  { %v1835_v29 = vpop.eup %1834  ;;  %828 = vrot.lane.b32.xlu0 %v1833_v22, %s2015_s2 }
 0x992   :  { %853 = vrot.lane.b32.xlu1 %v1835_v29, %s2015_s2  ;;  %v1837_v19 = vpop.eup %1836 }
 0x993   :  { %v1839_v20 = vpop.eup %1838  ;;  %v817_v21 = vadd.f32 1.0, %v1837_v19 }
 0x994   :  { %v846_v23 = vadd.f32 1.0, %v1839_v20 }
 0x995   :  { %823 = vrot.lane.b32.xlu0 %v822_v33, %s2014_s3  ;;  %1840 = vrcp.f32 %v817_v21 }
 0x996   :  { %1842 = vrcp.f32 %v846_v23 }
 0x99f   :  { %v1841_v24 = vpop.eup %1840 }
 0x9a0   :  { %v1843_v27 = vpop.eup %1842 }
 0x9a1   :  { %v851_v37 = vmul.f32 %v1843_v27, %v822_v33 }
 0xa03   :  { %v829_v26 = vpop.permute.xlu0 %828 }
 0xa04   :  { %v831_v28 = vmul.f32 %v1841_v24, %v829_v26  ;;  %v854_v30 = vpop.permute.xlu1 %853 }
 0xa05   :  { %v856_v31 = vmul.f32 %v1843_v27, %v854_v30 }
 0xa06   :  { %833 = vrot.lane.b32.xlu1 %v831_v28, %s2014_s3  ;;  %v1152_v28 = vld [vmem:[#allocation2 + $0x8] sm:$0x30] }
 0xa07   :  { %858 = vrot.lane.b32.xlu0 %v856_v31, %s2014_s3  ;;  %v824_v32 = vpop.permute.xlu0 %823 }
 0xa08   :  { %v826_v34 = vmul.f32 %v1841_v24, %v824_v32 }
 0xa78   :  { %v834_v36 = vpop.permute.xlu1 %833 }
 0xa79   :  { %v836_v38 = vadd.f32 %v834_v36, %v826_v34  ;;  %v859_v40 = vpop.permute.xlu0 %858  ;;  %v1151_v34 = vld [vmem:[#allocation2 + $0x10] sm:$0xc]  ;;  %v1154_v36 = vrot.slane %v1152_v28, 2 }
 0xa7a   :  { %v861_v41 = vadd.f32 %v859_v40, %v851_v37 }
 0xa7b   :  { %1844 = vtanh.f32 %v836_v38 }
 0xa7c   :  { %1846 = vtanh.f32 %v861_v41 }
 0xa85   :  { %v1845_v42 = vpop.eup %1844 }
 0xa86   :  { %v1847_v43 = vpop.eup %1846  ;;  %839 = vrot.lane.b32.xlu1 %v1845_v42, %s2015_s2 }
 0xa87   :  { %864 = vrot.lane.b32.xlu0 %v1847_v43, %s2015_s2 }
 0xaf8   :  { %v840_v44 = vpop.permute.xlu1 %839 }
 0xaf9   :  { %v842_v45 = vmul.f32 %v1841_v24, %v840_v44  ;;  %v865_v46 = vpop.permute.xlu0 %864 }
 0xafa   :  { %v867_v47 = vmul.f32 %v1843_v27, %v865_v46 }
 0xafb   :  { %869 = vrot.lane.b32.xlu1 %v842_v45, %s2014_s3 }
 0xafc   :  { %873 = vrot.lane.b32.xlu0 %v867_v47, %s2015_s2 }
 0xaff   :  { %880 = vrot.lane.b32.xlu1 %v836_v38, %s2016_s29 }
 0xb6d   :  { %v870_v48 = vpop.permute.xlu1 %869 }
 0xb6e   :  { %887 = vst.msk [vmem:[#allocation11] sm:$0xc0] %vm886_vm11, %v870_v48  ;;  %v874_v49 = vpop.permute.xlu0 %873 }
 0xb6f   :  { %v876_v50 = vsel %vm81_vm1, %v870_v48, %v874_v49  ;;  %890 = vst.msk [vmem:[#allocation11 + $0x2] sm:$0xc0] %vm889_vm12, %v874_v49 }
 0xb70   :  { %878 = vst.msk [vmem:[#allocation3 - $0x6] sm:$0xc0] %vm877_vm13, %v876_v50 }
 0xb71   :  { %v881_v51 = vpop.permute.xlu1 %880 }
 0xb72   :  { %v883_v52 = vsel %vm81_vm1, %v881_v51, %v861_v41 }
 0xb73   :  { %884 = vst.msk [vmem:[#allocation4 - $0x6] sm:$0xc0] %vm877_vm13, %v883_v52 }
 0xb77   :  { %v891_v53 = vld [vmem:[#allocation3] sm:$0x3] }
 0xb78   :  { %1623 = vmatmul.mubr.msk.f32.vlgmr.msra.gmra.mrb[4].mxu1 %vm189_vm2, %v891_v53 }
 0xb79   :  { %1321 = vmatprep.mubr.f32.mxu1 %v2013_v0 }
 0xb7a   :  { %v989_v62 = vld [vmem:[#allocation4] sm:$0x3] }
 0xc4b   :  { %v977_v54 = vpop.f32.mrb[4].mxu1 }
 0xc4c   :  { %v987_v57 = vadd.f32 %v982_v55, %v977_v54  ;;  %v979_v58 = vpop.f32.mrb[5].mxu1 }
 0xc4d   :  { %v988_v59 = vadd.f32 %v985_v56, %v979_v58 }
 0xc4e   :  { %1848 = vtanh.f32 %v987_v57  ;;  %v1624_v63 = vmul.f32 -1.442695, %v987_v57 }
 0xc4f   :  { %1850 = vtanh.f32 %v988_v59  ;;  %v1625_v1 = vmul.f32 -1.442695, %v988_v59 }
 0xc50   :  { %1852 = vpow2.f32 %v1624_v63  ;;  %v1241_v63 = vld [vmem:[#allocation10 + $0x18] sm:$0xff] }
 0xc51   :  { %1854 = vpow2.f32 %v1625_v1  ;;  %v1238_v1 = vld [vmem:[#allocation10] sm:$0xff] }
 0xc58   :  { %v1849_v60 = vpop.eup %1848 }
 0xc59   :  { %v1851_v61 = vpop.eup %1850  ;;  %1003 = vrot.lane.b32.xlu0 %v1849_v60, %s2015_s2 }
 0xc5a   :  { %1027 = vrot.lane.b32.xlu1 %v1851_v61, %s2015_s2  ;;  %v1853_v2 = vpop.eup %1852 }
 0xc5b   :  { %v1855_v3 = vpop.eup %1854  ;;  %v993_v4 = vadd.f32 1.0, %v1853_v2 }
 0xc5c   :  { %v1021_v5 = vadd.f32 1.0, %v1855_v3  ;;  %v1240_v3 = vld [vmem:[#allocation10 + $0x10] sm:$0xff] }
 0xc5d   :  { %998 = vrot.lane.b32.xlu0 %v989_v62, %s2014_s3  ;;  %1856 = vrcp.f32 %v993_v4  ;;  %v1243_v4 = vld [vmem:[#allocation10 + $0x28] sm:$0xff] }
 0xc5e   :  { %1858 = vrcp.f32 %v1021_v5  ;;  %v1245_v5 = vld [vmem:[#allocation10 + $0x38] sm:$0xff] }
 0xc67   :  { %v1857_v6 = vpop.eup %1856 }
 0xc68   :  { %v1859_v8 = vpop.eup %1858 }
 0xc69   :  { %v1025_v16 = vmul.f32 %v1859_v8, %v989_v62  ;;  %v1239_v62 = vld [vmem:[#allocation10 + $0x8] sm:$0xff] }
 0xc6a   :  { %v1739_v2 = vpack.c.bf16 %v1241_v63, %v1239_v62 }
 0xc6c   :  { %1740 = vmatprep.subr.bf16.mxu1 %v1739_v2  ;;  %1756 = vmatprep.subr.bf16.mxu0 %v1739_v2 }
 0xccb   :  { %v1004_v7 = vpop.permute.xlu0 %1003 }
 0xccc   :  { %v1006_v10 = vmul.f32 %v1857_v6, %v1004_v7  ;;  %v1028_v11 = vpop.permute.xlu1 %1027  ;;  %v1743_v7 = vpack.c.bf16 %v1245_v5, %v1243_v4 }
 0xccd   :  { %v1030_v12 = vmul.f32 %v1859_v8, %v1028_v11 }
 0xcce   :  { %1008 = vrot.lane.b32.xlu1 %v1006_v10, %s2014_s3  ;;  %v1244_v10 = vld [vmem:[#allocation10 + $0x30] sm:$0xff] }
 0xccf   :  { %1032 = vrot.lane.b32.xlu0 %v1030_v12, %s2014_s3  ;;  %v999_v14 = vpop.permute.xlu0 %998 }
 0xcd0   :  { %v1001_v15 = vmul.f32 %v1857_v6, %v999_v14 }
 0xd40   :  { %v1009_v13 = vpop.permute.xlu1 %1008 }
 0xd41   :  { %v1011_v17 = vadd.f32 %v1009_v13, %v1001_v15  ;;  %v1033_v18 = vpop.permute.xlu0 %1032  ;;  %v1247_v15 = vld [vmem:[#allocation10 + $0x48] sm:$0xff]  ;;  %v1249_v13 = vld [vmem:[#allocation10 + $0x58] sm:$0xff] }
 0xd42   :  { %v1035_v22 = vadd.f32 %v1033_v18, %v1025_v16  ;;  %v1747_v16 = vpack.c.bf16 %v1249_v13, %v1247_v15  ;;  %v1248_v18 = vld [vmem:[#allocation10 + $0x50] sm:$0xff] }
 0xd43   :  { %1860 = vtanh.f32 %v1011_v17 }
 0xd44   :  { %1862 = vtanh.f32 %v1035_v22 }
 0xd4d   :  { %v1861_v25 = vpop.eup %1860 }
 0xd4e   :  { %v1863_v29 = vpop.eup %1862  ;;  %1014 = vrot.lane.b32.xlu1 %v1861_v25, %s2015_s2  ;;  %v1251_v25 = vld [vmem:[#allocation10 + $0x68] sm:$0xff] }
 0xd4f   :  { %1038 = vrot.lane.b32.xlu0 %v1863_v29, %s2015_s2  ;;  %v1253_v29 = vld [vmem:[#allocation10 + $0x78] sm:$0xff] }
 0xdc0   :  { %v1015_v33 = vpop.permute.xlu1 %1014 }
 0xdc1   :  { %v1017_v35 = vmul.f32 %v1857_v6, %v1015_v33  ;;  %v1039_v39 = vpop.permute.xlu0 %1038  ;;  %v1741_v6 = vpack.c.bf16 %v1240_v3, %v1238_v1  ;;  %v1751_v33 = vpack.c.bf16 %v1253_v29, %v1251_v25  ;;  %v1505_v25 = vld [vmem:[#allocation2 + $0x10] sm:$0xc0] }
 0xdc2   :  { %v1041_v19 = vmul.f32 %v1859_v8, %v1039_v39  ;;  %v1242_v8 = vld [vmem:[#allocation10 + $0x20] sm:$0xff]  ;;  %v1252_v39 = vld [vmem:[#allocation10 + $0x70] sm:$0xff] }
 0xdc3   :  { %1043 = vrot.lane.b32.xlu1 %v1017_v35, %s2014_s3  ;;  %1742 = vmatpush1.bf16.msra.mxu1 %v1741_v6  ;;  %v1745_v11 = vpack.c.bf16 %v1244_v10, %v1242_v8  ;;  %v1250_v35 = vld [vmem:[#allocation10 + $0x60] sm:$0xff] }
 0xdc4   :  { %1047 = vrot.lane.b32.xlu0 %v1041_v19, %s2015_s2  ;;  %1744 = vmatprep.subr.bf16.mxu1 %v1743_v7  ;;  %v1753_v19 = vpack.c.bf16 %v1252_v39, %v1250_v35 }
 0xdc7   :  { %1053 = vrot.lane.b32.xlu1 %v1011_v17, %s2016_s29  ;;  %1746 = vmatpush1.bf16.msra.mxu1 %v1745_v11  ;;  %v1246_v17 = vld [vmem:[#allocation10 + $0x40] sm:$0xff] }
 0xdc8   :  { %1748 = vmatprep.subr.bf16.mxu1 %v1747_v16 }
 0xe35   :  { %v1044_v20 = vpop.permute.xlu1 %1043 }
 0xe36   :  { %1058 = vst.msk [vmem:[#allocation11 + $0x8] sm:$0x3] %vm340_vm3, %v1044_v20  ;;  %v1048_v21 = vpop.permute.xlu0 %1047 }
 0xe37   :  { %v1050_v23 = vsel %vm81_vm1, %v1044_v20, %v1048_v21  ;;  %1059 = vst.msk [vmem:[#allocation11 + $0x6] sm:$0x3] %vm343_vm4, %v1048_v21 }
 0xe38   :  { %1051 = vst.msk [vmem:[#allocation3] sm:$0x3] %vm169_vm0, %v1050_v23 }
 0xe39   :  { %v1054_v24 = vpop.permute.xlu1 %1053 }
 0xe3a   :  { %v1056_v26 = vsel %vm81_vm1, %v1054_v24, %v1035_v22  ;;  %v1749_v22 = vpack.c.bf16 %v1248_v18, %v1246_v17 }
 0xe3b   :  { %1057 = vst.msk [vmem:[#allocation4] sm:$0x3] %vm169_vm0, %v1056_v26 }
 0xe3c   :  { %1750 = vmatpush1.bf16.msra.mxu1 %v1749_v22 }
 0xe3d   :  { %1752 = vmatprep.subr.bf16.mxu1 %v1751_v33 }
 0xe3f   :  { %v1060_v27 = vld [vmem:[#allocation3] sm:$0x3] }
 0xe40   :  { %1626 = vmatmul.mubr.msk.f32.vlgmr.msra.gmra.mrb[8].mxu0 %vm189_vm2, %v1060_v27  ;;  %1754 = vmatpush1.bf16.msra.mxu1 %v1753_v19 }
 0xe41   :  { %1498 = vmatprep.mubr.f32.mxu0 %v2013_v0  ;;  %1758 = vmatpush1.bf16.msra.mxu0 %v1741_v6 }
 0xe42   :  { %v1164_v42 = vld [vmem:[#allocation4] sm:$0x3]  ;;  %1760 = vmatprep.subr.bf16.mxu0 %v1743_v7 }
 0xe43   :  { %v1173_v44 = vrot.slane %v1164_v42, 6 }
 0xe45   :  { %1762 = vmatpush1.bf16.msra.mxu0 %v1745_v11 }
 0xe46   :  { %1764 = vmatprep.subr.bf16.mxu0 %v1747_v16  ;;  %v1506_v16 = vld [vmem:[#allocation2 + $0x8] sm:$0x3] }
 0xe47   :  { %v1508_v29 = vrot.slane %v1506_v16, 2 }
 0xe49   :  { %1766 = vmatpush1.bf16.msra.mxu0 %v1749_v22 }
 0xe4a   :  { %1768 = vmatprep.subr.bf16.mxu0 %v1751_v33 }
 0xe4d   :  { %1770 = vmatpush1.bf16.msra.mxu0 %v1753_v19 }
 0xf13   :  { %v1146_v30 = vpop.f32.mrb[8].mxu0 }
 0xf14   :  { %v1158_v31 = vrot.slane %v1146_v30, 6  ;;  %v1148_v32 = vpop.f32.mrb[9].mxu0 }
 0xf15   :  { %v1159_v37 = vrot.slane %v1148_v32, 6 }
 0xf16   :  { %v1162_v38 = vadd.f32 %v1158_v31, %v1151_v34  ;;  %v1329_v34 = vld [vmem:[#allocation2 + $0x8] sm:$0xc] }
 0xf17   :  { %v1163_v40 = vadd.f32 %v1159_v37, %v1154_v36 }
 0xf18   :  { %1864 = vtanh.f32 %v1162_v38  ;;  %v1627_v0 = vmul.f32 -1.442695, %v1162_v38 }
 0xf19   :  { %1866 = vtanh.f32 %v1163_v40  ;;  %v1628_v45 = vmul.f32 -1.442695, %v1163_v40  ;;  %v1328_v40 = vld [vmem:[#allocation2 + $0x10] sm:$0x30] }
 0xf1a   :  { %1868 = vpow2.f32 %v1627_v0 }
 0xf1b   :  { %1870 = vpow2.f32 %v1628_v45 }
 0xf22   :  { %v1865_v41 = vpop.eup %1864 }
 0xf23   :  { %v1867_v43 = vpop.eup %1866  ;;  %1179 = vrot.lane.b32.xlu0 %v1865_v41, %s2015_s2  ;;  %v1331_v41 = vrot.slane %v1329_v34, 6 }
 0xf24   :  { %1204 = vrot.lane.b32.xlu1 %v1867_v43, %s2015_s2  ;;  %v1869_v46 = vpop.eup %1868 }
 0xf25   :  { %v1871_v47 = vpop.eup %1870  ;;  %v1168_v48 = vadd.f32 1.0, %v1869_v46 }
 0xf26   :  { %v1197_v49 = vadd.f32 1.0, %v1871_v47 }
 0xf27   :  { %1174 = vrot.lane.b32.xlu0 %v1173_v44, %s2014_s3  ;;  %1872 = vrcp.f32 %v1168_v48 }
 0xf28   :  { %1874 = vrcp.f32 %v1197_v49 }
 0xf31   :  { %v1873_v50 = vpop.eup %1872 }
 0xf32   :  { %v1875_v52 = vpop.eup %1874 }
 0xf33   :  { %v1202_v58 = vmul.f32 %v1875_v52, %v1173_v44 }
 0xf95   :  { %v1180_v51 = vpop.permute.xlu0 %1179 }
 0xf96   :  { %v1182_v53 = vmul.f32 %v1873_v50, %v1180_v51  ;;  %v1205_v9 = vpop.permute.xlu1 %1204 }
 0xf97   :  { %v1207_v54 = vmul.f32 %v1875_v52, %v1205_v9 }
 0xf98   :  { %1184 = vrot.lane.b32.xlu1 %v1182_v53, %s2014_s3 }
 0xf99   :  { %1209 = vrot.lane.b32.xlu0 %v1207_v54, %s2014_s3  ;;  %v1175_v55 = vpop.permute.xlu0 %1174 }
 0xf9a   :  { %v1177_v56 = vmul.f32 %v1873_v50, %v1175_v55 }
0x100a   :  { %v1185_v57 = vpop.permute.xlu1 %1184 }
0x100b   :  { %v1187_v59 = vadd.f32 %v1185_v57, %v1177_v56  ;;  %v1210_v60 = vpop.permute.xlu0 %1209 }
0x100c   :  { %v1212_v61 = vadd.f32 %v1210_v60, %v1202_v58 }
0x100d   :  { %1876 = vtanh.f32 %v1187_v59 }
0x100e   :  { %1878 = vtanh.f32 %v1212_v61 }
0x1017   :  { %v1877_v12 = vpop.eup %1876 }
0x1018   :  { %v1879_v14 = vpop.eup %1878  ;;  %1190 = vrot.lane.b32.xlu1 %v1877_v12, %s2015_s2 }
0x1019   :  { %1215 = vrot.lane.b32.xlu0 %v1879_v14, %s2015_s2 }
0x108a   :  { %v1191_v20 = vpop.permute.xlu1 %1190 }
0x108b   :  { %v1193_v21 = vmul.f32 %v1873_v50, %v1191_v20  ;;  %v1216_v23 = vpop.permute.xlu0 %1215 }
0x108c   :  { %v1218_v24 = vmul.f32 %v1875_v52, %v1216_v23 }
0x108d   :  { %1220 = vrot.lane.b32.xlu1 %v1193_v21, %s2014_s3 }
0x108e   :  { %1224 = vrot.lane.b32.xlu0 %v1218_v24, %s2015_s2 }
0x1091   :  { %1230 = vrot.lane.b32.xlu1 %v1187_v59, %s2016_s29 }
0x10ff   :  { %v1221_v26 = vpop.permute.xlu1 %1220 }
0x1100   :  { %1235 = vst.msk [vmem:[#allocation11 + $0x8] sm:$0xc] %vm522_vm5, %v1221_v26  ;;  %v1225_v27 = vpop.permute.xlu0 %1224 }
0x1101   :  { %v1227_v28 = vsel %vm81_vm1, %v1221_v26, %v1225_v27  ;;  %1236 = vst.msk [vmem:[#allocation11 + $0x2] sm:$0xc] %vm525_vm6, %v1225_v27 }
0x1102   :  { %1228 = vst.msk [vmem:[#allocation3 - $0x2] sm:$0xc] %vm513_vm7, %v1227_v28 }
0x1103   :  { %v1231_v30 = vpop.permute.xlu1 %1230 }
0x1104   :  { %v1233_v31 = vsel %vm81_vm1, %v1231_v30, %v1212_v61 }
0x1105   :  { %1234 = vst.msk [vmem:[#allocation4 - $0x2] sm:$0xc] %vm513_vm7, %v1233_v31 }
0x1109   :  { %v1237_v32 = vld [vmem:[#allocation3] sm:$0x3] }
0x110a   :  { %1629 = vmatmul.mubr.msk.f32.vlgmr.msra.gmra.mrb[6].mxu1 %vm189_vm2, %v1237_v32 }
0x110c   :  { %v1341_v45 = vld [vmem:[#allocation4] sm:$0x3] }
0x110d   :  { %v1350_v47 = vrot.slane %v1341_v45, 4 }
0x11dd   :  { %v1323_v36 = vpop.f32.mrb[6].mxu1 }
0x11de   :  { %v1335_v37 = vrot.slane %v1323_v36, 4  ;;  %v1325_v38 = vpop.f32.mrb[7].mxu1 }
0x11df   :  { %v1336_v42 = vrot.slane %v1325_v38, 4 }
0x11e0   :  { %v1339_v43 = vadd.f32 %v1335_v37, %v1328_v40 }
0x11e1   :  { %v1340_v44 = vadd.f32 %v1336_v42, %v1331_v41 }
0x11e2   :  { %1880 = vtanh.f32 %v1339_v43  ;;  %v1630_v48 = vmul.f32 -1.442695, %v1339_v43 }
0x11e3   :  { %1882 = vtanh.f32 %v1340_v44  ;;  %v1631_v49 = vmul.f32 -1.442695, %v1340_v44 }
0x11e4   :  { %1884 = vpow2.f32 %v1630_v48 }
0x11e5   :  { %1886 = vpow2.f32 %v1631_v49 }
0x11ec   :  { %v1881_v0 = vpop.eup %1880 }
0x11ed   :  { %v1883_v46 = vpop.eup %1882  ;;  %1356 = vrot.lane.b32.xlu0 %v1881_v0, %s2015_s2 }
0x11ee   :  { %1381 = vrot.lane.b32.xlu1 %v1883_v46, %s2015_s2  ;;  %v1885_v50 = vpop.eup %1884 }
0x11ef   :  { %v1887_v51 = vpop.eup %1886  ;;  %v1345_v52 = vadd.f32 1.0, %v1885_v50 }
0x11f0   :  { %v1374_v53 = vadd.f32 1.0, %v1887_v51 }
0x11f1   :  { %1351 = vrot.lane.b32.xlu0 %v1350_v47, %s2014_s3  ;;  %1888 = vrcp.f32 %v1345_v52 }
0x11f2   :  { %1890 = vrcp.f32 %v1374_v53 }
0x11fb   :  { %v1889_v9 = vpop.eup %1888 }
0x11fc   :  { %v1891_v55 = vpop.eup %1890 }
0x11fd   :  { %v1379_v62 = vmul.f32 %v1891_v55, %v1350_v47 }
0x125f   :  { %v1357_v54 = vpop.permute.xlu0 %1356 }
0x1260   :  { %v1359_v56 = vmul.f32 %v1889_v9, %v1357_v54  ;;  %v1382_v57 = vpop.permute.xlu1 %1381 }
0x1261   :  { %v1384_v58 = vmul.f32 %v1891_v55, %v1382_v57 }
0x1262   :  { %1361 = vrot.lane.b32.xlu1 %v1359_v56, %s2014_s3 }
0x1263   :  { %1386 = vrot.lane.b32.xlu0 %v1384_v58, %s2014_s3  ;;  %v1352_v59 = vpop.permute.xlu0 %1351 }
0x1264   :  { %v1354_v60 = vmul.f32 %v1889_v9, %v1352_v59 }
0x12d4   :  { %v1362_v61 = vpop.permute.xlu1 %1361 }
0x12d5   :  { %v1364_v63 = vadd.f32 %v1362_v61, %v1354_v60  ;;  %v1387_v1 = vpop.permute.xlu0 %1386 }
0x12d6   :  { %v1389_v2 = vadd.f32 %v1387_v1, %v1379_v62 }
0x12d7   :  { %1892 = vtanh.f32 %v1364_v63 }
0x12d8   :  { %1894 = vtanh.f32 %v1389_v2 }
0x12e1   :  { %v1893_v3 = vpop.eup %1892 }
0x12e2   :  { %v1895_v4 = vpop.eup %1894  ;;  %1367 = vrot.lane.b32.xlu1 %v1893_v3, %s2015_s2 }
0x12e3   :  { %1392 = vrot.lane.b32.xlu0 %v1895_v4, %s2015_s2 }
0x1354   :  { %v1368_v5 = vpop.permute.xlu1 %1367 }
0x1355   :  { %v1370_v6 = vmul.f32 %v1889_v9, %v1368_v5  ;;  %v1393_v7 = vpop.permute.xlu0 %1392 }
0x1356   :  { %v1395_v8 = vmul.f32 %v1891_v55, %v1393_v7 }
0x1357   :  { %1397 = vrot.lane.b32.xlu1 %v1370_v6, %s2014_s3 }
0x1358   :  { %1401 = vrot.lane.b32.xlu0 %v1395_v8, %s2015_s2 }
0x135b   :  { %1407 = vrot.lane.b32.xlu1 %v1364_v63, %s2016_s29 }
0x13c9   :  { %v1398_v10 = vpop.permute.xlu1 %1397 }
0x13ca   :  { %1412 = vst.msk [vmem:[#allocation11 + $0x8] sm:$0x30] %vm704_vm8, %v1398_v10  ;;  %v1402_v11 = vpop.permute.xlu0 %1401 }
0x13cb   :  { %v1404_v12 = vsel %vm81_vm1, %v1398_v10, %v1402_v11  ;;  %1413 = vst.msk [vmem:[#allocation11 - $0x2] sm:$0x30] %vm707_vm9, %v1402_v11 }
0x13cc   :  { %1405 = vst.msk [vmem:[#allocation3 - $0x4] sm:$0x30] %vm695_vm10, %v1404_v12 }
0x13cd   :  { %v1408_v14 = vpop.permute.xlu1 %1407 }
0x13ce   :  { %v1410_v15 = vsel %vm81_vm1, %v1408_v14, %v1389_v2 }
0x13cf   :  { %1411 = vst.msk [vmem:[#allocation4 - $0x4] sm:$0x30] %vm695_vm10, %v1410_v15 }
0x13d3   :  { %v1414_v13 = vld [vmem:[#allocation3] sm:$0x3] }
0x13d4   :  { %1632 = vmatmul.mubr.msk.f32.vlgmr.msra.gmra.mrb[10].mxu0 %vm189_vm2, %v1414_v13 }
0x13d6   :  { %v1518_v20 = vld [vmem:[#allocation4] sm:$0x3] }
0x13d7   :  { %v1527_v23 = vrot.slane %v1518_v20, 2 }
0x14a7   :  { %v1500_v17 = vpop.f32.mrb[10].mxu0 }
0x14a8   :  { %v1512_v18 = vrot.slane %v1500_v17, 2  ;;  %v1502_v22 = vpop.f32.mrb[11].mxu0 }
0x14a9   :  { %v1513_v33 = vrot.slane %v1502_v22, 2 }
0x14aa   :  { %v1516_v35 = vadd.f32 %v1512_v18, %v1505_v25 }
0x14ab   :  { %v1517_v39 = vadd.f32 %v1513_v33, %v1508_v29 }
0x14ac   :  { %1896 = vtanh.f32 %v1516_v35  ;;  %v1633_v24 = vmul.f32 -1.442695, %v1516_v35 }
0x14ad   :  { %1898 = vtanh.f32 %v1517_v39  ;;  %v1634_v26 = vmul.f32 -1.442695, %v1517_v39 }
0x14ae   :  { %1900 = vpow2.f32 %v1633_v24 }
0x14af   :  { %1902 = vpow2.f32 %v1634_v26 }
0x14b6   :  { %v1897_v19 = vpop.eup %1896 }
0x14b7   :  { %v1899_v21 = vpop.eup %1898  ;;  %1533 = vrot.lane.b32.xlu0 %v1897_v19, %s2015_s2 }
0x14b8   :  { %1558 = vrot.lane.b32.xlu1 %v1899_v21, %s2015_s2  ;;  %v1901_v27 = vpop.eup %1900 }
0x14b9   :  { %v1903_v28 = vpop.eup %1902  ;;  %v1522_v30 = vadd.f32 1.0, %v1901_v27 }
0x14ba   :  { %v1551_v31 = vadd.f32 1.0, %v1903_v28 }
0x14bb   :  { %1528 = vrot.lane.b32.xlu0 %v1527_v23, %s2014_s3  ;;  %1904 = vrcp.f32 %v1522_v30 }
0x14bc   :  { %1906 = vrcp.f32 %v1551_v31 }
0x14c5   :  { %v1905_v32 = vpop.eup %1904 }
0x14c6   :  { %v1907_v36 = vpop.eup %1906 }
0x14c7   :  { %v1556_v44 = vmul.f32 %v1907_v36, %v1527_v23 }
0x1529   :  { %v1534_v34 = vpop.permute.xlu0 %1533 }
0x152a   :  { %v1536_v37 = vmul.f32 %v1905_v32, %v1534_v34  ;;  %v1559_v38 = vpop.permute.xlu1 %1558 }
0x152b   :  { %v1561_v40 = vmul.f32 %v1907_v36, %v1559_v38 }
0x152c   :  { %1538 = vrot.lane.b32.xlu1 %v1536_v37, %s2014_s3 }
0x152d   :  { %1563 = vrot.lane.b32.xlu0 %v1561_v40, %s2014_s3  ;;  %v1529_v41 = vpop.permute.xlu0 %1528 }
0x152e   :  { %v1531_v42 = vmul.f32 %v1905_v32, %v1529_v41 }
0x159e   :  { %v1539_v43 = vpop.permute.xlu1 %1538 }
0x159f   :  { %v1541_v0 = vadd.f32 %v1539_v43, %v1531_v42  ;;  %v1564_v45 = vpop.permute.xlu0 %1563 }
0x15a0   :  { %v1566_v46 = vadd.f32 %v1564_v45, %v1556_v44 }
0x15a1   :  { %1908 = vtanh.f32 %v1541_v0 }
0x15a2   :  { %1910 = vtanh.f32 %v1566_v46 }
0x15ab   :  { %v1909_v47 = vpop.eup %1908 }
0x15ac   :  { %v1911_v48 = vpop.eup %1910  ;;  %1544 = vrot.lane.b32.xlu1 %v1909_v47, %s2015_s2 }
0x15ad   :  { %1569 = vrot.lane.b32.xlu0 %v1911_v48, %s2015_s2 }
0x161e   :  { %v1545_v49 = vpop.permute.xlu1 %1544 }
0x161f   :  { %v1547_v50 = vmul.f32 %v1905_v32, %v1545_v49  ;;  %v1570_v51 = vpop.permute.xlu0 %1569 }
0x1620   :  { %v1572_v52 = vmul.f32 %v1907_v36, %v1570_v51 }
0x1621   :  { %1574 = vrot.lane.b32.xlu1 %v1547_v50, %s2014_s3 }
0x1622   :  { %1578 = vrot.lane.b32.xlu0 %v1572_v52, %s2015_s2 }
0x1625   :  { %1584 = vrot.lane.b32.xlu1 %v1541_v0, %s2016_s29 }
0x1693   :  { %v1575_v53 = vpop.permute.xlu1 %1574 }
0x1694   :  { %1589 = vst.msk [vmem:[#allocation11 + $0x8] sm:$0xc0] %vm886_vm11, %v1575_v53  ;;  %v1579_v9 = vpop.permute.xlu0 %1578 }
0x1695   :  { %v1581_v54 = vsel %vm81_vm1, %v1575_v53, %v1579_v9  ;;  %1590 = vst.msk [vmem:[#allocation11 - $0x6] sm:$0xc0] %vm889_vm12, %v1579_v9 }
0x1696   :  { %1582 = vst.msk [vmem:[#allocation3 - $0x6] sm:$0xc0] %vm877_vm13, %v1581_v54 }
0x1697   :  { %1989 = shalt.err (!%p1986_p0)
}
0x1698   :  { %s1990_s9 = scalar_lea.hbm %s2327_s4, 256 }
0x1699   :  { %p1991_p1 = scmp.ne.s32.totalorder %s2327_s4, %s1990_s9  ;;  %p1994_p2 = scmp.lt.u32.totalorder %s1990_s9, %s2327_s4 }
0x169b   :  { %p1996_p3 = pnand %p1994_p2, %p1991_p1 }
0x169d   :  { %1999 = shalt.err (!%p1996_p3)
}
0x169e   :  { %s2018_s13 = smov 2   ;;  %v1585_v55 = vpop.permute.xlu1 %1584 }
0x169f   :  { %1602 = dma.vmem_to_hbm [thread:$0]  %s1597_s5, 256, %s2327_s4, [#allocation7], %s2014_s3, %s2014_s3, %s2018_s13   ;;  %v1587_v56 = vsel %vm81_vm1, %v1585_v55, %v1566_v46 }
0x16a0   :  { %1588 = vst.msk [vmem:[#allocation4 - $0x6] sm:$0xc0] %vm877_vm13, %v1587_v56 }
0x16a1   :  { %2004 = dma.done.wait [#allocation7], 256  }
0x16a2   :  { %2005 = vsyncadd [#allocation7], 4294967040 }
0x16a3   :  { %1606 = vsyncpa [#allocation6], 1 }
0x16a4   :  { %1607 = vsyncpa [#allocation9], 1 }
0x16a5   :  { %1608 = vsyncpa [#allocation7], 1 }

</bundles_post_ra>
